<compile_context>
chip_gen: v5e
topology: v5e:2x2
jax: 0.10.0
libtpu: 0.0.40
codegen_flags: <defaults>
</compile_context>

<pallas_src>
import functools
import math

import jax
import jax.numpy as jnp
from jax.experimental import pallas as pl
from jax.experimental.pallas import tpu as pltpu

EPS = 1e-5  # nn.LayerNorm default eps


# ---------------------------------------------------------------------------
# chip-aware VMEM budget
# ---------------------------------------------------------------------------
def _tpu_vmem_budget():
    """(scoped vmem limit, #TensorCores heuristic) for the current chip."""
    cap = 128 * 1024 * 1024
    try:
        cap = int(pltpu.get_tpu_info().vmem_capacity_bytes)
    except Exception:
        pass  # fall back to v5e/v6e capacity
    # v7x exposes 64 MiB per TensorCore and has 2 TCs/chip; v5e/v6e: 128 MiB / 1 TC.
    n_tc = 2 if cap <= 64 * 1024 * 1024 else 1
    limit = int(cap * 3 // 4)  # ~48 MiB on v7x, ~96 MiB on v5e/v6e
    return limit, n_tc


def _pick_batch_block(B, N, C, hidden, vmem_limit, n_tc):
    """Largest divisor of B whose activation block fits the VMEM budget while
    leaving >= n_tc steps on the parallel batch grid axis (v7x megacore)."""
    # per-layer weight bytes (bf16), double-buffered by the BlockSpec pipeline
    w_bytes = 2 * 2 * (4 * C * C + 2 * C * hidden)
    q_chunk = min(N, 256)
    # rough per-batch-element live activation bytes (residual, qkv, mlp, scores)
    act_per_b = 4 * N * (8 * C + 2 * hidden) + 8 * q_chunk * N
    avail = vmem_limit - w_bytes - (4 << 20)
    bb_cap = max(1, avail // max(1, act_per_b))
    bb_cap = min(bb_cap, max(1, B // max(1, n_tc)))
    bb = 1
    for d in range(1, B + 1):
        if B % d == 0 and d <= bb_cap:
            bb = d
    return bb


# ---------------------------------------------------------------------------
# in-kernel math helpers (f32 element-wise math; only MXU operands are bf16)
# ---------------------------------------------------------------------------
def _erf_f32(x):
    # Eigen/XLA float32 rational erf approximation (same polynomial XLA uses).
    clamp = 3.832506856900711
    x = jnp.clip(x, -clamp, clamp)
    x2 = x * x
    p = jnp.float32(-2.72614225801306e-10)
    for c in (2.77068142495902e-08, -2.10102402082508e-06, -5.69250639462346e-05,
              -7.34990630326855e-04, -2.95459980854025e-03, -1.60960333262415e-02):
        p = p * x2 + jnp.float32(c)
    p = p * x
    q = jnp.float32(-1.45660718464996e-05)
    for c in (-2.13374055278905e-04, -1.68282697438203e-03, -7.37332916720468e-03,
              -1.42647390514189e-02):
        q = q * x2 + jnp.float32(c)
    # divide -> EUP reciprocal (q is bounded away from 0); frees the VALU slot
    return p * pl.reciprocal(q, approx=True)


def _gelu_exact(x):
    # nn.GELU() default (erf-based, not tanh approximation)
    return 0.5 * x * (1.0 + _erf_f32(x * (1.0 / math.sqrt(2.0))))


def _layernorm(x, w, b):
    # x: (M, C) f32, w/b: (1, C) f32
    mu = jnp.mean(x, axis=-1, keepdims=True)
    var = jnp.mean((x - mu) ** 2, axis=-1, keepdims=True)
    return (x - mu) * jax.lax.rsqrt(var + EPS) * w + b


# ---------------------------------------------------------------------------
# fused decoder kernel: one transformer block per (batch_block, layer) grid
# step; final norm + head fused into the last layer step.
# ---------------------------------------------------------------------------
def _decoder_kernel(x_ref, ln1_w_ref, ln1_b_ref, qkv_w_ref, proj_w_ref, proj_b_ref,
                    ln2_w_ref, ln2_b_ref, fc1_w_ref, fc1_b_ref, fc2_w_ref, fc2_b_ref,
                    nrm_w_ref, nrm_b_ref, head_w_ref, head_b_ref,
                    head_o_ref, acc_ref, *, num_heads, tail_tokens, q_chunk):
    layer = pl.program_id(1)
    Bb, N, C = acc_ref.shape
    hd = C // num_heads

    @pl.when(layer == 0)
    def _():
        acc_ref[...] = x_ref[...].astype(jnp.float32)

    # flat (Bb*N, C) f32 residual slab (row concat avoids reshapes for any N)
    if Bb == 1:
        x = acc_ref[0]
    else:
        x = jnp.concatenate([acc_ref[b] for b in range(Bb)], axis=0)

    # ---- attention branch (pre-norm); qk scale pre-folded into bf16 qkv weight
    h = _layernorm(x, ln1_w_ref[0], ln1_b_ref[0])
    qkv = jnp.dot(h.astype(jnp.bfloat16), qkv_w_ref[0],
                  preferred_element_type=jnp.float32)          # (Bb*N, 3C)

    per_batch = []
    for b in range(Bb):                                        # static
        r0 = b * N
        heads = []
        for hh in range(num_heads):                            # static, unrolled
            # TODO(synk): for hd < 128 these lane slices are not 128-aligned; a
            # head-padded qkv layout would trade extra weight HBM traffic for
            # cheaper extracts.
            lo = hh * hd
            kh = qkv[r0:r0 + N, C + lo:C + lo + hd].astype(jnp.bfloat16)
            vh = qkv[r0:r0 + N, 2 * C + lo:2 * C + lo + hd].astype(jnp.bfloat16)
            chunks = []
            for q0 in range(0, N, q_chunk):     # bound (N,N) f32 intermediates
                qs = min(q_chunk, N - q0)
                qh = qkv[r0 + q0:r0 + q0 + qs, lo:lo + hd].astype(jnp.bfloat16)
                s = jax.lax.dot_general(qh, kh, (((1,), (1,)), ((), ())),
                                        preferred_element_type=jnp.float32)
                s = s - jnp.max(s, axis=-1, keepdims=True)
                e = jnp.exp(s)
                pr = e * pl.reciprocal(jnp.sum(e, axis=-1, keepdims=True),
                                       approx=True)
                chunks.append(jnp.dot(pr.astype(jnp.bfloat16), vh,
                                      preferred_element_type=jnp.float32))
            oh = chunks[0] if len(chunks) == 1 else jnp.concatenate(chunks, axis=0)
            heads.append(oh.astype(jnp.bfloat16))
        per_batch.append(heads[0] if num_heads == 1
                         else jnp.concatenate(heads, axis=-1))  # (N, C) bf16
    attn_cat = per_batch[0] if Bb == 1 else jnp.concatenate(per_batch, axis=0)
    # single full-width K=C projection matmul for all batches/heads
    attn = jnp.dot(attn_cat, proj_w_ref[0], preferred_element_type=jnp.float32)
    x = x + attn + proj_b_ref[0]        # dropout / DropPath identity (eval)

    # ---- MLP branch (pre-norm), exact erf GELU ----
    h2 = _layernorm(x, ln2_w_ref[0], ln2_b_ref[0])
    f = jnp.dot(h2.astype(jnp.bfloat16), fc1_w_ref[0],
                preferred_element_type=jnp.float32) + fc1_b_ref[0]
    f = _gelu_exact(f)
    y = jnp.dot(f.astype(jnp.bfloat16), fc2_w_ref[0],
                preferred_element_type=jnp.float32) + fc2_b_ref[0]
    x = x + y

    if Bb == 1:
        acc_ref[0] = x
    else:
        for b in range(Bb):
            acc_ref[b] = x[b * N:(b + 1) * N, :]

    # ---- fused final LayerNorm + head on the last `tail_tokens` tokens ----
    @pl.when(layer == pl.num_programs(1) - 1)
    def _():
        T = tail_tokens
        tails = [x[b * N + N - T:b * N + N, :] for b in range(Bb)]
        tail = tails[0] if Bb == 1 else jnp.concatenate(tails, axis=0)  # (Bb*T, C)
        hn = _layernorm(tail, nrm_w_ref[...], nrm_b_ref[...])
        out = jnp.dot(hn.astype(jnp.bfloat16), head_w_ref[...],        # lane-dense
                      preferred_element_type=jnp.float32) + head_b_ref[...]
        for b in range(Bb):
            head_o_ref[b] = out[b * T:(b + 1) * T, :].astype(head_o_ref.dtype)


# ---------------------------------------------------------------------------
# wrapper
# ---------------------------------------------------------------------------
def decoder_forward(x, packed, return_token_num, num_heads):
    """Mirrors PretrainVisionTransformerDecoder.forward (eval, init_values=None)."""
    # TODO(synk): torch.utils.checkpoint (use_checkpoint=True) has no kernel-level
    # equivalent; forward semantics are identical without it.
    B, N, C = x.shape
    depth = packed["ln1_w"].shape[0]
    hidden = packed["fc1_w"].shape[2]
    ncp = packed["head_w"].shape[1]              # padded (lane-dense) class count
    T = return_token_num if return_token_num > 0 else N

    vmem_limit, n_tc = _tpu_vmem_budget()
    Bb = _pick_batch_block(B, N, C, hidden, vmem_limit, n_tc)
    grid = (B // Bb, depth)
    q_chunk = min(N, 256)

    def wspec(shape):   # per-layer weight: select layer l (pipelined prefetch)
        return pl.BlockSpec((1,) + shape, lambda b, l: (l, 0, 0))

    def cspec(shape):   # layer-constant weight (final norm / head): VMEM-resident
        return pl.BlockSpec(shape, lambda b, l: tuple(0 for _ in shape))

    kernel = functools.partial(_decoder_kernel, num_heads=num_heads,
                               tail_tokens=T, q_chunk=q_chunk)

    # advisory cost estimate for XLA scheduling around the custom call
    flops = depth * B * (2 * N * C * 3 * C + 4 * N * N * C + 2 * N * C * C
                         + 4 * N * C * hidden) + 2 * B * T * C * ncp
    transc = depth * B * (num_heads * N * N + N * hidden)
    byts = (depth * 2 * (4 * C * C + 2 * C * hidden)
            + B * N * C * x.dtype.itemsize + B * T * ncp * x.dtype.itemsize
            + 2 * C * ncp)

    # TODO(synk): for very large C / mlp_ratio on v7x (64 MiB VMEM), tile the
    # fc1/fc2/qkv matmuls over the hidden/contraction dim with an inner pipeline
    # instead of loading full per-layer weights.
    out = pl.pallas_call(
        kernel,
        out_shape=jax.ShapeDtypeStruct((B, T, ncp), x.dtype),
        grid=grid,
        in_specs=[
            pl.BlockSpec((Bb, N, C), lambda b, l: (b, 0, 0)),   # x (read at layer 0)
            wspec((1, C)), wspec((1, C)),                       # ln1 w/b
            wspec((C, 3 * C)),                                  # fused qkv (pre-T, q scaled)
            wspec((C, C)), wspec((1, C)),                       # proj w (pre-T) / b
            wspec((1, C)), wspec((1, C)),                       # ln2 w/b
            wspec((C, hidden)), wspec((1, hidden)),             # fc1 w (pre-T) / b
            wspec((hidden, C)), wspec((1, C)),                  # fc2 w (pre-T) / b
            cspec((1, C)), cspec((1, C)),                       # final norm w/b
            cspec((C, ncp)), cspec((1, ncp)),                   # head w (pre-T, padded) / b
        ],
        out_specs=pl.BlockSpec((Bb, T, ncp), lambda b, l: (b, 0, 0)),
        scratch_shapes=[pltpu.VMEM((Bb, N, C), jnp.float32)],   # resident f32 residual
        compiler_params=pltpu.CompilerParams(
            dimension_semantics=("parallel", "arbitrary"),
            vmem_limit_bytes=vmem_limit),
        cost_estimate=pl.CostEstimate(flops=int(flops), transcendentals=int(transc),
                                      bytes_accessed=int(byts)),
    )(x, packed["ln1_w"], packed["ln1_b"], packed["qkv_w"], packed["proj_w"],
      packed["proj_b"], packed["ln2_w"], packed["ln2_b"], packed["fc1_w"],
      packed["fc1_b"], packed["fc2_w"], packed["fc2_b"], packed["norm_w"],
      packed["norm_b"], packed["head_w"], packed["head_b"])
    return out[:, :, :packed["num_classes"]]


# ---------------------------------------------------------------------------
# parameter init (PyTorch layout, matches the module's _init_weights scheme)
# ---------------------------------------------------------------------------
def _xavier_uniform(key, out_f, in_f):
    limit = math.sqrt(6.0 / (in_f + out_f))
    return jax.random.uniform(key, (out_f, in_f), jnp.float32, -limit, limit)


def init_decoder_params(key, embed_dim, depth, num_heads, mlp_ratio, num_classes):
    C = embed_dim
    hidden = int(C * mlp_ratio)
    blocks = []
    for _ in range(depth):
        key, k_qkv, k_proj, k_f1, k_f2 = jax.random.split(key, 5)
        qkv_w = _xavier_uniform(k_qkv, 3 * C, C)          # (3C, C), qkv_bias=False
        blocks.append({
            "ln1_w": jnp.ones((1, C), jnp.float32),
            "ln1_b": jnp.zeros((1, C), jnp.float32),
            "q_w": qkv_w[0:C], "k_w": qkv_w[C:2 * C], "v_w": qkv_w[2 * C:3 * C],
            "proj_w": _xavier_uniform(k_proj, C, C),
            "proj_b": jnp.zeros((1, C), jnp.float32),
            "ln2_w": jnp.ones((1, C), jnp.float32),
            "ln2_b": jnp.zeros((1, C), jnp.float32),
            "fc1_w": _xavier_uniform(k_f1, hidden, C),
            "fc1_b": jnp.zeros((1, hidden), jnp.float32),
            "fc2_w": _xavier_uniform(k_f2, C, hidden),
            "fc2_b": jnp.zeros((1, C), jnp.float32),
        })
    key, k_head = jax.random.split(key)
    return {
        "blocks": blocks,
        "norm_w": jnp.ones((1, C), jnp.float32),
        "norm_b": jnp.zeros((1, C), jnp.float32),
        "head_w": _xavier_uniform(k_head, num_classes, C),
        "head_b": jnp.zeros((1, num_classes), jnp.float32),
    }


# ---------------------------------------------------------------------------
# wrapper-side packing: stack layers, pre-transpose, fold qk scale into q,
# cast matmul weights to bf16, pad head output dim to a multiple of 128.
# NOTE: bf16 matmul operands (incl. the q-scale fold) are a deliberate policy;
# expect ~1e-2 deviation from an fp32 PyTorch reference.
# ---------------------------------------------------------------------------
def pack_decoder_params(params, num_heads):
    blocks = params["blocks"]
    C = blocks[0]["q_w"].shape[0]
    hd = C // num_heads
    scale = hd ** (-0.5)

    def stack(key, fn=lambda a: a):
        return jnp.stack([fn(b[key]) for b in blocks], axis=0)

    def qkv_t(b):
        w = jnp.concatenate([b["q_w"] * scale, b["k_w"], b["v_w"]], axis=0)  # (3C, C)
        return w.T.astype(jnp.bfloat16)                                      # (C, 3C)

    t16 = lambda w: w.T.astype(jnp.bfloat16)   # (out,in) -> (in,out) bf16

    packed = {
        "ln1_w": stack("ln1_w"), "ln1_b": stack("ln1_b"),
        "qkv_w": jnp.stack([qkv_t(b) for b in blocks], axis=0),
        "proj_w": stack("proj_w", t16), "proj_b": stack("proj_b"),
        "ln2_w": stack("ln2_w"), "ln2_b": stack("ln2_b"),
        "fc1_w": stack("fc1_w", t16), "fc1_b": stack("fc1_b"),
        "fc2_w": stack("fc2_w", t16), "fc2_b": stack("fc2_b"),
    }

    nc, Cdim = params["head_w"].shape
    ncp = ((nc + 127) // 128) * 128
    hw = jnp.zeros((Cdim, ncp), jnp.float32).at[:, :nc].set(params["head_w"].T)
    hb = jnp.zeros((1, ncp), jnp.float32).at[:, :nc].set(params["head_b"])
    packed.update({
        "norm_w": params["norm_w"], "norm_b": params["norm_b"],
        "head_w": hw.astype(jnp.bfloat16), "head_b": hb,
        "num_classes": nc,
    })
    return packed


# ---------------------------------------------------------------------------
if __name__ == "__main__":
    # small decoder config: patch_size=2, tubelet_size=2 -> num_classes = 3*2*2^2 = 24
    B, N, C = 2, 8, 32
    depth, num_heads, mlp_ratio = 2, 4, 4.0
    num_classes = 3 * 2 * 2 ** 2      # 24
    return_token_num = 3

    key = jax.random.PRNGKey(0)
    key, kx = jax.random.split(key)
    x = jax.random.normal(kx, (B, N, C), jnp.float32)

    raw_params = init_decoder_params(key, C, depth, num_heads, mlp_ratio, num_classes)
    packed = pack_decoder_params(raw_params, num_heads)

    out = decoder_forward(x, packed, return_token_num, num_heads)
    out = jax.block_until_ready(out)
    assert out.shape == (B, return_token_num, num_classes), out.shape
    assert bool(jnp.all(jnp.isfinite(out)))
    print("KERNEL_OK")
</pallas_src>

<mosaic_0001>
module attributes {stable_mosaic.version = 11 : i64} {
  func.func @_decoder_kernel(%arg0: i32, %arg1: i32, %arg2: memref<2x8x32xf32, #tpu.memory_space<vmem>>, %arg3: memref<1x1x32xf32, #tpu.memory_space<vmem>>, %arg4: memref<1x1x32xf32, #tpu.memory_space<vmem>>, %arg5: memref<1x32x96xbf16, #tpu.memory_space<vmem>>, %arg6: memref<1x32x32xbf16, #tpu.memory_space<vmem>>, %arg7: memref<1x1x32xf32, #tpu.memory_space<vmem>>, %arg8: memref<1x1x32xf32, #tpu.memory_space<vmem>>, %arg9: memref<1x1x32xf32, #tpu.memory_space<vmem>>, %arg10: memref<1x32x128xbf16, #tpu.memory_space<vmem>>, %arg11: memref<1x1x128xf32, #tpu.memory_space<vmem>>, %arg12: memref<1x128x32xbf16, #tpu.memory_space<vmem>>, %arg13: memref<1x1x32xf32, #tpu.memory_space<vmem>>, %arg14: memref<1x32xf32, #tpu.memory_space<vmem>>, %arg15: memref<1x32xf32, #tpu.memory_space<vmem>>, %arg16: memref<32x128xbf16, #tpu.memory_space<vmem>>, %arg17: memref<1x128xf32, #tpu.memory_space<vmem>>, %arg18: memref<2x3x128xf32, #tpu.memory_space<vmem>>, %arg19: memref<2x8x32xf32, #tpu.memory_space<vmem>>) attributes {dimension_semantics = [#tpu.dimension_semantics<parallel>, #tpu.dimension_semantics<arbitrary>], iteration_bounds = array<i64: 1, 2>, scalar_prefetch = 0 : i64, scratch_operands = 1 : i64, tpu.core_type = #tpu.core_type<tc>, window_params = [{transform_indices = @transform_0, window_bounds = array<i64: 2, 8, 32>}, {transform_indices = @transform_1, window_bounds = array<i64: 1, 1, 32>}, {transform_indices = @transform_2, window_bounds = array<i64: 1, 1, 32>}, {transform_indices = @transform_3, window_bounds = array<i64: 1, 32, 96>}, {transform_indices = @transform_4, window_bounds = array<i64: 1, 32, 32>}, {transform_indices = @transform_5, window_bounds = array<i64: 1, 1, 32>}, {transform_indices = @transform_6, window_bounds = array<i64: 1, 1, 32>}, {transform_indices = @transform_7, window_bounds = array<i64: 1, 1, 32>}, {transform_indices = @transform_8, window_bounds = array<i64: 1, 32, 128>}, {transform_indices = @transform_9, window_bounds = array<i64: 1, 1, 128>}, {transform_indices = @transform_10, window_bounds = array<i64: 1, 128, 32>}, {transform_indices = @transform_11, window_bounds = array<i64: 1, 1, 32>}, {pipeline_mode = #tpu.pipeline_mode<synchronous>, transform_indices = @transform_12, window_bounds = array<i64: 1, 32>}, {pipeline_mode = #tpu.pipeline_mode<synchronous>, transform_indices = @transform_13, window_bounds = array<i64: 1, 32>}, {pipeline_mode = #tpu.pipeline_mode<synchronous>, transform_indices = @transform_14, window_bounds = array<i64: 32, 128>}, {pipeline_mode = #tpu.pipeline_mode<synchronous>, transform_indices = @transform_15, window_bounds = array<i64: 1, 128>}, {transform_indices = @transform_16, window_bounds = array<i64: 2, 3, 128>}]} {
    %c0_i32 = arith.constant 0 : i32
    %0 = arith.cmpi eq, %arg1, %c0_i32 : i32
    %1 = arith.extui %0 : i1 to i32
    %c0_i32_0 = arith.constant 0 : i32
    %2 = arith.cmpi ne, %1, %c0_i32_0 : i32
    scf.if %2 {
      %c0_107 = arith.constant 0 : index
      %c0_108 = arith.constant 0 : index
      %c0_109 = arith.constant 0 : index
      %310 = vector.load %arg2[%c0_107, %c0_108, %c0_109] : memref<2x8x32xf32, #tpu.memory_space<vmem>>, vector<2x8x32xf32>
      %c0_110 = arith.constant 0 : index
      %c0_111 = arith.constant 0 : index
      %c0_112 = arith.constant 0 : index
      %311 = vector.load %arg19[%c0_110, %c0_111, %c0_112] : memref<2x8x32xf32, #tpu.memory_space<vmem>>, vector<2x8x32xf32>
      tpu.vector_store %arg19[%c0_110, %c0_111, %c0_112], %310 {strides = array<i32>} : memref<2x8x32xf32, #tpu.memory_space<vmem>>, vector<2x8x32xf32>,
    } else {
    }
    %c0 = arith.constant 0 : index
    %c0_1 = arith.constant 0 : index
    %c0_2 = arith.constant 0 : index
    %3 = vector.load %arg19[%c0, %c0_1, %c0_2] : memref<2x8x32xf32, #tpu.memory_space<vmem>>, vector<1x8x32xf32>
    %4 = vector.shape_cast %3 : vector<1x8x32xf32> to vector<8x32xf32>
    %c1 = arith.constant 1 : index
    %c0_3 = arith.constant 0 : index
    %c0_4 = arith.constant 0 : index
    %5 = vector.load %arg19[%c1, %c0_3, %c0_4] : memref<2x8x32xf32, #tpu.memory_space<vmem>>, vector<1x8x32xf32>
    %6 = vector.shape_cast %5 : vector<1x8x32xf32> to vector<8x32xf32>
    %7 = tpu.concatenate %4, %6 in 0 : vector<8x32xf32>, vector<8x32xf32> -> vector<16x32xf32>
    %c0_5 = arith.constant 0 : index
    %c0_6 = arith.constant 0 : index
    %c0_7 = arith.constant 0 : index
    %8 = vector.load %arg3[%c0_5, %c0_6, %c0_7] : memref<1x1x32xf32, #tpu.memory_space<vmem>>, vector<1x1x32xf32>
    %9 = vector.shape_cast %8 : vector<1x1x32xf32> to vector<1x32xf32>
    %c0_8 = arith.constant 0 : index
    %c0_9 = arith.constant 0 : index
    %c0_10 = arith.constant 0 : index
    %10 = vector.load %arg4[%c0_8, %c0_9, %c0_10] : memref<1x1x32xf32, #tpu.memory_space<vmem>>, vector<1x1x32xf32>
    %11 = vector.shape_cast %10 : vector<1x1x32xf32> to vector<1x32xf32>
    %cst = arith.constant dense<0.000000e+00> : vector<16xf32>
    %12 = vector.multi_reduction <add>, %7, %cst [1] : vector<16x32xf32> to vector<16xf32>
    %13 = vector.shape_cast %12 : vector<16xf32> to vector<16x1xf32>
    %cst_11 = arith.constant 3.200000e+01 : f32
    %14 = vector.broadcast %cst_11 : f32 to vector<16x1xf32>
    %15 = arith.divf %13, %14 : vector<16x1xf32>
    %16 = vector.broadcast %15 : vector<16x1xf32> to vector<16x32xf32>
    %17 = arith.subf %7, %16 : vector<16x32xf32>
    %18 = arith.mulf %17, %17 : vector<16x32xf32>
    %cst_12 = arith.constant dense<0.000000e+00> : vector<16xf32>
    %19 = vector.multi_reduction <add>, %18, %cst_12 [1] : vector<16x32xf32> to vector<16xf32>
    %20 = vector.shape_cast %19 : vector<16xf32> to vector<16x1xf32>
    %cst_13 = arith.constant 3.200000e+01 : f32
    %21 = vector.broadcast %cst_13 : f32 to vector<16x1xf32>
    %22 = arith.divf %20, %21 : vector<16x1xf32>
    %23 = vector.broadcast %15 : vector<16x1xf32> to vector<16x32xf32>
    %24 = arith.subf %7, %23 : vector<16x32xf32>
    %cst_14 = arith.constant 9.99999974E-6 : f32
    %25 = vector.broadcast %cst_14 : f32 to vector<16x1xf32>
    %26 = arith.addf %22, %25 : vector<16x1xf32>
    %27 = math.rsqrt %26 : vector<16x1xf32>
    %28 = vector.broadcast %27 : vector<16x1xf32> to vector<16x32xf32>
    %29 = arith.mulf %24, %28 : vector<16x32xf32>
    %30 = vector.broadcast %9 : vector<1x32xf32> to vector<16x32xf32>
    %31 = arith.mulf %29, %30 : vector<16x32xf32>
    %32 = vector.broadcast %11 : vector<1x32xf32> to vector<16x32xf32>
    %33 = arith.addf %31, %32 : vector<16x32xf32>
    %34 = arith.truncf %33 : vector<16x32xf32> to vector<16x32xbf16>
    %c0_15 = arith.constant 0 : index
    %c0_16 = arith.constant 0 : index
    %c0_17 = arith.constant 0 : index
    %35 = vector.load %arg5[%c0_15, %c0_16, %c0_17] : memref<1x32x96xbf16, #tpu.memory_space<vmem>>, vector<1x32x96xbf16>
    %36 = vector.shape_cast %35 : vector<1x32x96xbf16> to vector<32x96xbf16>
    %cst_18 = arith.constant dense<0.000000e+00> : vector<16x96xf32>
    %37 = tpu.matmul %34, %36, %cst_18 {dimension_numbers = #tpu.dot_dimension_numbers<[1], [0], [0], [1], [0, 0, 1, 1], [], []>} : vector<16x32xbf16>, vector<32x96xbf16>, vector<16x96xf32> -> vector<16x96xf32>
    %38 = vector.extract_strided_slice %37 {offsets = [0, 32], sizes = [8, 8], strides = [1, 1]} : vector<16x96xf32> to vector<8x8xf32>
    %39 = arith.truncf %38 : vector<8x8xf32> to vector<8x8xbf16>
    %40 = vector.extract_strided_slice %37 {offsets = [0, 64], sizes = [8, 8], strides = [1, 1]} : vector<16x96xf32> to vector<8x8xf32>
    %41 = arith.truncf %40 : vector<8x8xf32> to vector<8x8xbf16>
    %42 = vector.extract_strided_slice %37 {offsets = [0, 0], sizes = [8, 8], strides = [1, 1]} : vector<16x96xf32> to vector<8x8xf32>
    %43 = arith.truncf %42 : vector<8x8xf32> to vector<8x8xbf16>
    %cst_19 = arith.constant dense<0.000000e+00> : vector<8x8xf32>
    %44 = tpu.matmul %43, %39, %cst_19 {dimension_numbers = #tpu.dot_dimension_numbers<[1], [1], [0], [0], [0, 0, 1, 0], [], []>} : vector<8x8xbf16>, vector<8x8xbf16>, vector<8x8xf32> -> vector<8x8xf32>
    %cst_20 = arith.constant dense<0xFF800000> : vector<8xf32>
    %45 = vector.multi_reduction <maximumf>, %44, %cst_20 [1] : vector<8x8xf32> to vector<8xf32>
    %46 = vector.shape_cast %45 : vector<8xf32> to vector<8x1xf32>
    %47 = vector.broadcast %46 : vector<8x1xf32> to vector<8x8xf32>
    %48 = arith.subf %44, %47 : vector<8x8xf32>
    %49 = math.exp %48 : vector<8x8xf32>
    %cst_21 = arith.constant dense<0.000000e+00> : vector<8xf32>
    %50 = vector.multi_reduction <add>, %49, %cst_21 [1] : vector<8x8xf32> to vector<8xf32>
    %51 = vector.shape_cast %50 : vector<8xf32> to vector<8x1xf32>
    %52 = tpu.reciprocal %51 {approx = true} : vector<8x1xf32> -> vector<8x1xf32>
    %53 = vector.broadcast %52 : vector<8x1xf32> to vector<8x8xf32>
    %54 = arith.mulf %49, %53 : vector<8x8xf32>
    %55 = arith.truncf %54 : vector<8x8xf32> to vector<8x8xbf16>
    %cst_22 = arith.constant dense<0.000000e+00> : vector<8x8xf32>
    %56 = tpu.matmul %55, %41, %cst_22 {dimension_numbers = #tpu.dot_dimension_numbers<[1], [0], [0], [1], [0, 0, 1, 1], [], []>} : vector<8x8xbf16>, vector<8x8xbf16>, vector<8x8xf32> -> vector<8x8xf32>
    %57 = arith.truncf %56 : vector<8x8xf32> to vector<8x8xbf16>
    %58 = vector.extract_strided_slice %37 {offsets = [0, 40], sizes = [8, 8], strides = [1, 1]} : vector<16x96xf32> to vector<8x8xf32>
    %59 = arith.truncf %58 : vector<8x8xf32> to vector<8x8xbf16>
    %60 = vector.extract_strided_slice %37 {offsets = [0, 72], sizes = [8, 8], strides = [1, 1]} : vector<16x96xf32> to vector<8x8xf32>
    %61 = arith.truncf %60 : vector<8x8xf32> to vector<8x8xbf16>
    %62 = vector.extract_strided_slice %37 {offsets = [0, 8], sizes = [8, 8], strides = [1, 1]} : vector<16x96xf32> to vector<8x8xf32>
    %63 = arith.truncf %62 : vector<8x8xf32> to vector<8x8xbf16>
    %cst_23 = arith.constant dense<0.000000e+00> : vector<8x8xf32>
    %64 = tpu.matmul %63, %59, %cst_23 {dimension_numbers = #tpu.dot_dimension_numbers<[1], [1], [0], [0], [0, 0, 1, 0], [], []>} : vector<8x8xbf16>, vector<8x8xbf16>, vector<8x8xf32> -> vector<8x8xf32>
    %cst_24 = arith.constant dense<0xFF800000> : vector<8xf32>
    %65 = vector.multi_reduction <maximumf>, %64, %cst_24 [1] : vector<8x8xf32> to vector<8xf32>
    %66 = vector.shape_cast %65 : vector<8xf32> to vector<8x1xf32>
    %67 = vector.broadcast %66 : vector<8x1xf32> to vector<8x8xf32>
    %68 = arith.subf %64, %67 : vector<8x8xf32>
    %69 = math.exp %68 : vector<8x8xf32>
    %cst_25 = arith.constant dense<0.000000e+00> : vector<8xf32>
    %70 = vector.multi_reduction <add>, %69, %cst_25 [1] : vector<8x8xf32> to vector<8xf32>
    %71 = vector.shape_cast %70 : vector<8xf32> to vector<8x1xf32>
    %72 = tpu.reciprocal %71 {approx = true} : vector<8x1xf32> -> vector<8x1xf32>
    %73 = vector.broadcast %72 : vector<8x1xf32> to vector<8x8xf32>
    %74 = arith.mulf %69, %73 : vector<8x8xf32>
    %75 = arith.truncf %74 : vector<8x8xf32> to vector<8x8xbf16>
    %cst_26 = arith.constant dense<0.000000e+00> : vector<8x8xf32>
    %76 = tpu.matmul %75, %61, %cst_26 {dimension_numbers = #tpu.dot_dimension_numbers<[1], [0], [0], [1], [0, 0, 1, 1], [], []>} : vector<8x8xbf16>, vector<8x8xbf16>, vector<8x8xf32> -> vector<8x8xf32>
    %77 = arith.truncf %76 : vector<8x8xf32> to vector<8x8xbf16>
    %78 = vector.extract_strided_slice %37 {offsets = [0, 48], sizes = [8, 8], strides = [1, 1]} : vector<16x96xf32> to vector<8x8xf32>
    %79 = arith.truncf %78 : vector<8x8xf32> to vector<8x8xbf16>
    %80 = vector.extract_strided_slice %37 {offsets = [0, 80], sizes = [8, 8], strides = [1, 1]} : vector<16x96xf32> to vector<8x8xf32>
    %81 = arith.truncf %80 : vector<8x8xf32> to vector<8x8xbf16>
    %82 = vector.extract_strided_slice %37 {offsets = [0, 16], sizes = [8, 8], strides = [1, 1]} : vector<16x96xf32> to vector<8x8xf32>
    %83 = arith.truncf %82 : vector<8x8xf32> to vector<8x8xbf16>
    %cst_27 = arith.constant dense<0.000000e+00> : vector<8x8xf32>
    %84 = tpu.matmul %83, %79, %cst_27 {dimension_numbers = #tpu.dot_dimension_numbers<[1], [1], [0], [0], [0, 0, 1, 0], [], []>} : vector<8x8xbf16>, vector<8x8xbf16>, vector<8x8xf32> -> vector<8x8xf32>
    %cst_28 = arith.constant dense<0xFF800000> : vector<8xf32>
    %85 = vector.multi_reduction <maximumf>, %84, %cst_28 [1] : vector<8x8xf32> to vector<8xf32>
    %86 = vector.shape_cast %85 : vector<8xf32> to vector<8x1xf32>
    %87 = vector.broadcast %86 : vector<8x1xf32> to vector<8x8xf32>
    %88 = arith.subf %84, %87 : vector<8x8xf32>
    %89 = math.exp %88 : vector<8x8xf32>
    %cst_29 = arith.constant dense<0.000000e+00> : vector<8xf32>
    %90 = vector.multi_reduction <add>, %89, %cst_29 [1] : vector<8x8xf32> to vector<8xf32>
    %91 = vector.shape_cast %90 : vector<8xf32> to vector<8x1xf32>
    %92 = tpu.reciprocal %91 {approx = true} : vector<8x1xf32> -> vector<8x1xf32>
    %93 = vector.broadcast %92 : vector<8x1xf32> to vector<8x8xf32>
    %94 = arith.mulf %89, %93 : vector<8x8xf32>
    %95 = arith.truncf %94 : vector<8x8xf32> to vector<8x8xbf16>
    %cst_30 = arith.constant dense<0.000000e+00> : vector<8x8xf32>
    %96 = tpu.matmul %95, %81, %cst_30 {dimension_numbers = #tpu.dot_dimension_numbers<[1], [0], [0], [1], [0, 0, 1, 1], [], []>} : vector<8x8xbf16>, vector<8x8xbf16>, vector<8x8xf32> -> vector<8x8xf32>
    %97 = arith.truncf %96 : vector<8x8xf32> to vector<8x8xbf16>
    %98 = vector.extract_strided_slice %37 {offsets = [0, 56], sizes = [8, 8], strides = [1, 1]} : vector<16x96xf32> to vector<8x8xf32>
    %99 = arith.truncf %98 : vector<8x8xf32> to vector<8x8xbf16>
    %100 = vector.extract_strided_slice %37 {offsets = [0, 88], sizes = [8, 8], strides = [1, 1]} : vector<16x96xf32> to vector<8x8xf32>
    %101 = arith.truncf %100 : vector<8x8xf32> to vector<8x8xbf16>
    %102 = vector.extract_strided_slice %37 {offsets = [0, 24], sizes = [8, 8], strides = [1, 1]} : vector<16x96xf32> to vector<8x8xf32>
    %103 = arith.truncf %102 : vector<8x8xf32> to vector<8x8xbf16>
    %cst_31 = arith.constant dense<0.000000e+00> : vector<8x8xf32>
    %104 = tpu.matmul %103, %99, %cst_31 {dimension_numbers = #tpu.dot_dimension_numbers<[1], [1], [0], [0], [0, 0, 1, 0], [], []>} : vector<8x8xbf16>, vector<8x8xbf16>, vector<8x8xf32> -> vector<8x8xf32>
    %cst_32 = arith.constant dense<0xFF800000> : vector<8xf32>
    %105 = vector.multi_reduction <maximumf>, %104, %cst_32 [1] : vector<8x8xf32> to vector<8xf32>
    %106 = vector.shape_cast %105 : vector<8xf32> to vector<8x1xf32>
    %107 = vector.broadcast %106 : vector<8x1xf32> to vector<8x8xf32>
    %108 = arith.subf %104, %107 : vector<8x8xf32>
    %109 = math.exp %108 : vector<8x8xf32>
    %cst_33 = arith.constant dense<0.000000e+00> : vector<8xf32>
    %110 = vector.multi_reduction <add>, %109, %cst_33 [1] : vector<8x8xf32> to vector<8xf32>
    %111 = vector.shape_cast %110 : vector<8xf32> to vector<8x1xf32>
    %112 = tpu.reciprocal %111 {approx = true} : vector<8x1xf32> -> vector<8x1xf32>
    %113 = vector.broadcast %112 : vector<8x1xf32> to vector<8x8xf32>
    %114 = arith.mulf %109, %113 : vector<8x8xf32>
    %115 = arith.truncf %114 : vector<8x8xf32> to vector<8x8xbf16>
    %cst_34 = arith.constant dense<0.000000e+00> : vector<8x8xf32>
    %116 = tpu.matmul %115, %101, %cst_34 {dimension_numbers = #tpu.dot_dimension_numbers<[1], [0], [0], [1], [0, 0, 1, 1], [], []>} : vector<8x8xbf16>, vector<8x8xbf16>, vector<8x8xf32> -> vector<8x8xf32>
    %117 = arith.truncf %116 : vector<8x8xf32> to vector<8x8xbf16>
    %118 = tpu.concatenate %57, %77, %97, %117 in 1 : vector<8x8xbf16>, vector<8x8xbf16>, vector<8x8xbf16>, vector<8x8xbf16> -> vector<8x32xbf16>
    %119 = vector.extract_strided_slice %37 {offsets = [8, 32], sizes = [8, 8], strides = [1, 1]} : vector<16x96xf32> to vector<8x8xf32>
    %120 = arith.truncf %119 : vector<8x8xf32> to vector<8x8xbf16>
    %121 = vector.extract_strided_slice %37 {offsets = [8, 64], sizes = [8, 8], strides = [1, 1]} : vector<16x96xf32> to vector<8x8xf32>
    %122 = arith.truncf %121 : vector<8x8xf32> to vector<8x8xbf16>
    %123 = vector.extract_strided_slice %37 {offsets = [8, 0], sizes = [8, 8], strides = [1, 1]} : vector<16x96xf32> to vector<8x8xf32>
    %124 = arith.truncf %123 : vector<8x8xf32> to vector<8x8xbf16>
    %cst_35 = arith.constant dense<0.000000e+00> : vector<8x8xf32>
    %125 = tpu.matmul %124, %120, %cst_35 {dimension_numbers = #tpu.dot_dimension_numbers<[1], [1], [0], [0], [0, 0, 1, 0], [], []>} : vector<8x8xbf16>, vector<8x8xbf16>, vector<8x8xf32> -> vector<8x8xf32>
    %cst_36 = arith.constant dense<0xFF800000> : vector<8xf32>
    %126 = vector.multi_reduction <maximumf>, %125, %cst_36 [1] : vector<8x8xf32> to vector<8xf32>
    %127 = vector.shape_cast %126 : vector<8xf32> to vector<8x1xf32>
    %128 = vector.broadcast %127 : vector<8x1xf32> to vector<8x8xf32>
    %129 = arith.subf %125, %128 : vector<8x8xf32>
    %130 = math.exp %129 : vector<8x8xf32>
    %cst_37 = arith.constant dense<0.000000e+00> : vector<8xf32>
    %131 = vector.multi_reduction <add>, %130, %cst_37 [1] : vector<8x8xf32> to vector<8xf32>
    %132 = vector.shape_cast %131 : vector<8xf32> to vector<8x1xf32>
    %133 = tpu.reciprocal %132 {approx = true} : vector<8x1xf32> -> vector<8x1xf32>
    %134 = vector.broadcast %133 : vector<8x1xf32> to vector<8x8xf32>
    %135 = arith.mulf %130, %134 : vector<8x8xf32>
    %136 = arith.truncf %135 : vector<8x8xf32> to vector<8x8xbf16>
    %cst_38 = arith.constant dense<0.000000e+00> : vector<8x8xf32>
    %137 = tpu.matmul %136, %122, %cst_38 {dimension_numbers = #tpu.dot_dimension_numbers<[1], [0], [0], [1], [0, 0, 1, 1], [], []>} : vector<8x8xbf16>, vector<8x8xbf16>, vector<8x8xf32> -> vector<8x8xf32>
    %138 = arith.truncf %137 : vector<8x8xf32> to vector<8x8xbf16>
    %139 = vector.extract_strided_slice %37 {offsets = [8, 40], sizes = [8, 8], strides = [1, 1]} : vector<16x96xf32> to vector<8x8xf32>
    %140 = arith.truncf %139 : vector<8x8xf32> to vector<8x8xbf16>
    %141 = vector.extract_strided_slice %37 {offsets = [8, 72], sizes = [8, 8], strides = [1, 1]} : vector<16x96xf32> to vector<8x8xf32>
    %142 = arith.truncf %141 : vector<8x8xf32> to vector<8x8xbf16>
    %143 = vector.extract_strided_slice %37 {offsets = [8, 8], sizes = [8, 8], strides = [1, 1]} : vector<16x96xf32> to vector<8x8xf32>
    %144 = arith.truncf %143 : vector<8x8xf32> to vector<8x8xbf16>
    %cst_39 = arith.constant dense<0.000000e+00> : vector<8x8xf32>
    %145 = tpu.matmul %144, %140, %cst_39 {dimension_numbers = #tpu.dot_dimension_numbers<[1], [1], [0], [0], [0, 0, 1, 0], [], []>} : vector<8x8xbf16>, vector<8x8xbf16>, vector<8x8xf32> -> vector<8x8xf32>
    %cst_40 = arith.constant dense<0xFF800000> : vector<8xf32>
    %146 = vector.multi_reduction <maximumf>, %145, %cst_40 [1] : vector<8x8xf32> to vector<8xf32>
    %147 = vector.shape_cast %146 : vector<8xf32> to vector<8x1xf32>
    %148 = vector.broadcast %147 : vector<8x1xf32> to vector<8x8xf32>
    %149 = arith.subf %145, %148 : vector<8x8xf32>
    %150 = math.exp %149 : vector<8x8xf32>
    %cst_41 = arith.constant dense<0.000000e+00> : vector<8xf32>
    %151 = vector.multi_reduction <add>, %150, %cst_41 [1] : vector<8x8xf32> to vector<8xf32>
    %152 = vector.shape_cast %151 : vector<8xf32> to vector<8x1xf32>
    %153 = tpu.reciprocal %152 {approx = true} : vector<8x1xf32> -> vector<8x1xf32>
    %154 = vector.broadcast %153 : vector<8x1xf32> to vector<8x8xf32>
    %155 = arith.mulf %150, %154 : vector<8x8xf32>
    %156 = arith.truncf %155 : vector<8x8xf32> to vector<8x8xbf16>
    %cst_42 = arith.constant dense<0.000000e+00> : vector<8x8xf32>
    %157 = tpu.matmul %156, %142, %cst_42 {dimension_numbers = #tpu.dot_dimension_numbers<[1], [0], [0], [1], [0, 0, 1, 1], [], []>} : vector<8x8xbf16>, vector<8x8xbf16>, vector<8x8xf32> -> vector<8x8xf32>
    %158 = arith.truncf %157 : vector<8x8xf32> to vector<8x8xbf16>
    %159 = vector.extract_strided_slice %37 {offsets = [8, 48], sizes = [8, 8], strides = [1, 1]} : vector<16x96xf32> to vector<8x8xf32>
    %160 = arith.truncf %159 : vector<8x8xf32> to vector<8x8xbf16>
    %161 = vector.extract_strided_slice %37 {offsets = [8, 80], sizes = [8, 8], strides = [1, 1]} : vector<16x96xf32> to vector<8x8xf32>
    %162 = arith.truncf %161 : vector<8x8xf32> to vector<8x8xbf16>
    %163 = vector.extract_strided_slice %37 {offsets = [8, 16], sizes = [8, 8], strides = [1, 1]} : vector<16x96xf32> to vector<8x8xf32>
    %164 = arith.truncf %163 : vector<8x8xf32> to vector<8x8xbf16>
    %cst_43 = arith.constant dense<0.000000e+00> : vector<8x8xf32>
    %165 = tpu.matmul %164, %160, %cst_43 {dimension_numbers = #tpu.dot_dimension_numbers<[1], [1], [0], [0], [0, 0, 1, 0], [], []>} : vector<8x8xbf16>, vector<8x8xbf16>, vector<8x8xf32> -> vector<8x8xf32>
    %cst_44 = arith.constant dense<0xFF800000> : vector<8xf32>
    %166 = vector.multi_reduction <maximumf>, %165, %cst_44 [1] : vector<8x8xf32> to vector<8xf32>
    %167 = vector.shape_cast %166 : vector<8xf32> to vector<8x1xf32>
    %168 = vector.broadcast %167 : vector<8x1xf32> to vector<8x8xf32>
    %169 = arith.subf %165, %168 : vector<8x8xf32>
    %170 = math.exp %169 : vector<8x8xf32>
    %cst_45 = arith.constant dense<0.000000e+00> : vector<8xf32>
    %171 = vector.multi_reduction <add>, %170, %cst_45 [1] : vector<8x8xf32> to vector<8xf32>
    %172 = vector.shape_cast %171 : vector<8xf32> to vector<8x1xf32>
    %173 = tpu.reciprocal %172 {approx = true} : vector<8x1xf32> -> vector<8x1xf32>
    %174 = vector.broadcast %173 : vector<8x1xf32> to vector<8x8xf32>
    %175 = arith.mulf %170, %174 : vector<8x8xf32>
    %176 = arith.truncf %175 : vector<8x8xf32> to vector<8x8xbf16>
    %cst_46 = arith.constant dense<0.000000e+00> : vector<8x8xf32>
    %177 = tpu.matmul %176, %162, %cst_46 {dimension_numbers = #tpu.dot_dimension_numbers<[1], [0], [0], [1], [0, 0, 1, 1], [], []>} : vector<8x8xbf16>, vector<8x8xbf16>, vector<8x8xf32> -> vector<8x8xf32>
    %178 = arith.truncf %177 : vector<8x8xf32> to vector<8x8xbf16>
    %179 = vector.extract_strided_slice %37 {offsets = [8, 56], sizes = [8, 8], strides = [1, 1]} : vector<16x96xf32> to vector<8x8xf32>
    %180 = arith.truncf %179 : vector<8x8xf32> to vector<8x8xbf16>
    %181 = vector.extract_strided_slice %37 {offsets = [8, 88], sizes = [8, 8], strides = [1, 1]} : vector<16x96xf32> to vector<8x8xf32>
    %182 = arith.truncf %181 : vector<8x8xf32> to vector<8x8xbf16>
    %183 = vector.extract_strided_slice %37 {offsets = [8, 24], sizes = [8, 8], strides = [1, 1]} : vector<16x96xf32> to vector<8x8xf32>
    %184 = arith.truncf %183 : vector<8x8xf32> to vector<8x8xbf16>
    %cst_47 = arith.constant dense<0.000000e+00> : vector<8x8xf32>
    %185 = tpu.matmul %184, %180, %cst_47 {dimension_numbers = #tpu.dot_dimension_numbers<[1], [1], [0], [0], [0, 0, 1, 0], [], []>} : vector<8x8xbf16>, vector<8x8xbf16>, vector<8x8xf32> -> vector<8x8xf32>
    %cst_48 = arith.constant dense<0xFF800000> : vector<8xf32>
    %186 = vector.multi_reduction <maximumf>, %185, %cst_48 [1] : vector<8x8xf32> to vector<8xf32>
    %187 = vector.shape_cast %186 : vector<8xf32> to vector<8x1xf32>
    %188 = vector.broadcast %187 : vector<8x1xf32> to vector<8x8xf32>
    %189 = arith.subf %185, %188 : vector<8x8xf32>
    %190 = math.exp %189 : vector<8x8xf32>
    %cst_49 = arith.constant dense<0.000000e+00> : vector<8xf32>
    %191 = vector.multi_reduction <add>, %190, %cst_49 [1] : vector<8x8xf32> to vector<8xf32>
    %192 = vector.shape_cast %191 : vector<8xf32> to vector<8x1xf32>
    %193 = tpu.reciprocal %192 {approx = true} : vector<8x1xf32> -> vector<8x1xf32>
    %194 = vector.broadcast %193 : vector<8x1xf32> to vector<8x8xf32>
    %195 = arith.mulf %190, %194 : vector<8x8xf32>
    %196 = arith.truncf %195 : vector<8x8xf32> to vector<8x8xbf16>
    %cst_50 = arith.constant dense<0.000000e+00> : vector<8x8xf32>
    %197 = tpu.matmul %196, %182, %cst_50 {dimension_numbers = #tpu.dot_dimension_numbers<[1], [0], [0], [1], [0, 0, 1, 1], [], []>} : vector<8x8xbf16>, vector<8x8xbf16>, vector<8x8xf32> -> vector<8x8xf32>
    %198 = arith.truncf %197 : vector<8x8xf32> to vector<8x8xbf16>
    %199 = tpu.concatenate %138, %158, %178, %198 in 1 : vector<8x8xbf16>, vector<8x8xbf16>, vector<8x8xbf16>, vector<8x8xbf16> -> vector<8x32xbf16>
    %200 = tpu.concatenate %118, %199 in 0 : vector<8x32xbf16>, vector<8x32xbf16> -> vector<16x32xbf16>
    %c0_51 = arith.constant 0 : index
    %c0_52 = arith.constant 0 : index
    %c0_53 = arith.constant 0 : index
    %201 = vector.load %arg6[%c0_51, %c0_52, %c0_53] : memref<1x32x32xbf16, #tpu.memory_space<vmem>>, vector<1x32x32xbf16>
    %202 = vector.shape_cast %201 : vector<1x32x32xbf16> to vector<32x32xbf16>
    %cst_54 = arith.constant dense<0.000000e+00> : vector<16x32xf32>
    %203 = tpu.matmul %200, %202, %cst_54 {dimension_numbers = #tpu.dot_dimension_numbers<[1], [0], [0], [1], [0, 0, 1, 1], [], []>} : vector<16x32xbf16>, vector<32x32xbf16>, vector<16x32xf32> -> vector<16x32xf32>
    %204 = arith.addf %7, %203 : vector<16x32xf32>
    %c0_55 = arith.constant 0 : index
    %c0_56 = arith.constant 0 : index
    %c0_57 = arith.constant 0 : index
    %205 = vector.load %arg7[%c0_55, %c0_56, %c0_57] : memref<1x1x32xf32, #tpu.memory_space<vmem>>, vector<1x1x32xf32>
    %206 = vector.shape_cast %205 : vector<1x1x32xf32> to vector<1x32xf32>
    %207 = vector.broadcast %206 : vector<1x32xf32> to vector<16x32xf32>
    %208 = arith.addf %204, %207 : vector<16x32xf32>
    %c0_58 = arith.constant 0 : index
    %c0_59 = arith.constant 0 : index
    %c0_60 = arith.constant 0 : index
    %209 = vector.load %arg8[%c0_58, %c0_59, %c0_60] : memref<1x1x32xf32, #tpu.memory_space<vmem>>, vector<1x1x32xf32>
    %210 = vector.shape_cast %209 : vector<1x1x32xf32> to vector<1x32xf32>
    %c0_61 = arith.constant 0 : index
    %c0_62 = arith.constant 0 : index
    %c0_63 = arith.constant 0 : index
    %211 = vector.load %arg9[%c0_61, %c0_62, %c0_63] : memref<1x1x32xf32, #tpu.memory_space<vmem>>, vector<1x1x32xf32>
    %212 = vector.shape_cast %211 : vector<1x1x32xf32> to vector<1x32xf32>
    %cst_64 = arith.constant dense<0.000000e+00> : vector<16xf32>
    %213 = vector.multi_reduction <add>, %208, %cst_64 [1] : vector<16x32xf32> to vector<16xf32>
    %214 = vector.shape_cast %213 : vector<16xf32> to vector<16x1xf32>
    %cst_65 = arith.constant 3.200000e+01 : f32
    %215 = vector.broadcast %cst_65 : f32 to vector<16x1xf32>
    %216 = arith.divf %214, %215 : vector<16x1xf32>
    %217 = vector.broadcast %216 : vector<16x1xf32> to vector<16x32xf32>
    %218 = arith.subf %208, %217 : vector<16x32xf32>
    %219 = arith.mulf %218, %218 : vector<16x32xf32>
    %cst_66 = arith.constant dense<0.000000e+00> : vector<16xf32>
    %220 = vector.multi_reduction <add>, %219, %cst_66 [1] : vector<16x32xf32> to vector<16xf32>
    %221 = vector.shape_cast %220 : vector<16xf32> to vector<16x1xf32>
    %cst_67 = arith.constant 3.200000e+01 : f32
    %222 = vector.broadcast %cst_67 : f32 to vector<16x1xf32>
    %223 = arith.divf %221, %222 : vector<16x1xf32>
    %224 = vector.broadcast %216 : vector<16x1xf32> to vector<16x32xf32>
    %225 = arith.subf %208, %224 : vector<16x32xf32>
    %cst_68 = arith.constant 9.99999974E-6 : f32
    %226 = vector.broadcast %cst_68 : f32 to vector<16x1xf32>
    %227 = arith.addf %223, %226 : vector<16x1xf32>
    %228 = math.rsqrt %227 : vector<16x1xf32>
    %229 = vector.broadcast %228 : vector<16x1xf32> to vector<16x32xf32>
    %230 = arith.mulf %225, %229 : vector<16x32xf32>
    %231 = vector.broadcast %210 : vector<1x32xf32> to vector<16x32xf32>
    %232 = arith.mulf %230, %231 : vector<16x32xf32>
    %233 = vector.broadcast %212 : vector<1x32xf32> to vector<16x32xf32>
    %234 = arith.addf %232, %233 : vector<16x32xf32>
    %235 = arith.truncf %234 : vector<16x32xf32> to vector<16x32xbf16>
    %c0_69 = arith.constant 0 : index
    %c0_70 = arith.constant 0 : index
    %c0_71 = arith.constant 0 : index
    %236 = vector.load %arg10[%c0_69, %c0_70, %c0_71] : memref<1x32x128xbf16, #tpu.memory_space<vmem>>, vector<1x32x128xbf16>
    %237 = vector.shape_cast %236 : vector<1x32x128xbf16> to vector<32x128xbf16>
    %cst_72 = arith.constant dense<0.000000e+00> : vector<16x128xf32>
    %238 = tpu.matmul %235, %237, %cst_72 {dimension_numbers = #tpu.dot_dimension_numbers<[1], [0], [0], [1], [0, 0, 1, 1], [], []>} : vector<16x32xbf16>, vector<32x128xbf16>, vector<16x128xf32> -> vector<16x128xf32>
    %c0_73 = arith.constant 0 : index
    %c0_74 = arith.constant 0 : index
    %c0_75 = arith.constant 0 : index
    %239 = vector.load %arg11[%c0_73, %c0_74, %c0_75] : memref<1x1x128xf32, #tpu.memory_space<vmem>>, vector<1x1x128xf32>
    %240 = vector.shape_cast %239 : vector<1x1x128xf32> to vector<1x128xf32>
    %241 = vector.broadcast %240 : vector<1x128xf32> to vector<16x128xf32>
    %242 = arith.addf %238, %241 : vector<16x128xf32>
    %cst_76 = arith.constant 5.000000e-01 : f32
    %243 = vector.broadcast %cst_76 : f32 to vector<16x128xf32>
    %244 = arith.mulf %243, %242 : vector<16x128xf32>
    %cst_77 = arith.constant 0.707106769 : f32
    %245 = vector.broadcast %cst_77 : f32 to vector<16x128xf32>
    %246 = arith.mulf %242, %245 : vector<16x128xf32>
    %cst_78 = arith.constant -3.8325069 : f32
    %cst_79 = arith.constant 3.8325069 : f32
    %247 = vector.broadcast %cst_78 : f32 to vector<16x128xf32>
    %248 = arith.maximumf %247, %246 : vector<16x128xf32>
    %249 = vector.broadcast %cst_79 : f32 to vector<16x128xf32>
    %250 = arith.minimumf %249, %248 : vector<16x128xf32>
    %251 = arith.mulf %250, %250 : vector<16x128xf32>
    %cst_80 = arith.constant -2.72614237E-10 : f32
    %252 = vector.broadcast %cst_80 : f32 to vector<16x128xf32>
    %253 = arith.mulf %252, %251 : vector<16x128xf32>
    %cst_81 = arith.constant 2.77068146E-8 : f32
    %254 = vector.broadcast %cst_81 : f32 to vector<16x128xf32>
    %255 = arith.addf %253, %254 : vector<16x128xf32>
    %256 = arith.mulf %255, %251 : vector<16x128xf32>
    %cst_82 = arith.constant -2.10102394E-6 : f32
    %257 = vector.broadcast %cst_82 : f32 to vector<16x128xf32>
    %258 = arith.addf %256, %257 : vector<16x128xf32>
    %259 = arith.mulf %258, %251 : vector<16x128xf32>
    %cst_83 = arith.constant -5.69250624E-5 : f32
    %260 = vector.broadcast %cst_83 : f32 to vector<16x128xf32>
    %261 = arith.addf %259, %260 : vector<16x128xf32>
    %262 = arith.mulf %261, %251 : vector<16x128xf32>
    %cst_84 = arith.constant -7.34990637E-4 : f32
    %263 = vector.broadcast %cst_84 : f32 to vector<16x128xf32>
    %264 = arith.addf %262, %263 : vector<16x128xf32>
    %265 = arith.mulf %264, %251 : vector<16x128xf32>
    %cst_85 = arith.constant -2.954600e-03 : f32
    %266 = vector.broadcast %cst_85 : f32 to vector<16x128xf32>
    %267 = arith.addf %265, %266 : vector<16x128xf32>
    %268 = arith.mulf %267, %251 : vector<16x128xf32>
    %cst_86 = arith.constant -0.0160960332 : f32
    %269 = vector.broadcast %cst_86 : f32 to vector<16x128xf32>
    %270 = arith.addf %268, %269 : vector<16x128xf32>
    %271 = arith.mulf %270, %250 : vector<16x128xf32>
    %cst_87 = arith.constant -1.45660715E-5 : f32
    %272 = vector.broadcast %cst_87 : f32 to vector<16x128xf32>
    %273 = arith.mulf %272, %251 : vector<16x128xf32>
    %cst_88 = arith.constant -2.13374049E-4 : f32
    %274 = vector.broadcast %cst_88 : f32 to vector<16x128xf32>
    %275 = arith.addf %273, %274 : vector<16x128xf32>
    %276 = arith.mulf %275, %251 : vector<16x128xf32>
    %cst_89 = arith.constant -0.00168282702 : f32
    %277 = vector.broadcast %cst_89 : f32 to vector<16x128xf32>
    %278 = arith.addf %276, %277 : vector<16x128xf32>
    %279 = arith.mulf %278, %251 : vector<16x128xf32>
    %cst_90 = arith.constant -0.00737332925 : f32
    %280 = vector.broadcast %cst_90 : f32 to vector<16x128xf32>
    %281 = arith.addf %279, %280 : vector<16x128xf32>
    %282 = arith.mulf %281, %251 : vector<16x128xf32>
    %cst_91 = arith.constant -0.0142647391 : f32
    %283 = vector.broadcast %cst_91 : f32 to vector<16x128xf32>
    %284 = arith.addf %282, %283 : vector<16x128xf32>
    %285 = tpu.reciprocal %284 {approx = true} : vector<16x128xf32> -> vector<16x128xf32>
    %286 = arith.mulf %271, %285 : vector<16x128xf32>
    %cst_92 = arith.constant 1.000000e+00 : f32
    %287 = vector.broadcast %cst_92 : f32 to vector<16x128xf32>
    %288 = arith.addf %287, %286 : vector<16x128xf32>
    %289 = arith.mulf %244, %288 : vector<16x128xf32>
    %290 = arith.truncf %289 : vector<16x128xf32> to vector<16x128xbf16>
    %c0_93 = arith.constant 0 : index
    %c0_94 = arith.constant 0 : index
    %c0_95 = arith.constant 0 : index
    %291 = vector.load %arg12[%c0_93, %c0_94, %c0_95] : memref<1x128x32xbf16, #tpu.memory_space<vmem>>, vector<1x128x32xbf16>
    %292 = vector.shape_cast %291 : vector<1x128x32xbf16> to vector<128x32xbf16>
    %cst_96 = arith.constant dense<0.000000e+00> : vector<16x32xf32>
    %293 = tpu.matmul %290, %292, %cst_96 {dimension_numbers = #tpu.dot_dimension_numbers<[1], [0], [0], [1], [0, 0, 1, 1], [], []>} : vector<16x128xbf16>, vector<128x32xbf16>, vector<16x32xf32> -> vector<16x32xf32>
    %c0_97 = arith.constant 0 : index
    %c0_98 = arith.constant 0 : index
    %c0_99 = arith.constant 0 : index
    %294 = vector.load %arg13[%c0_97, %c0_98, %c0_99] : memref<1x1x32xf32, #tpu.memory_space<vmem>>, vector<1x1x32xf32>
    %295 = vector.shape_cast %294 : vector<1x1x32xf32> to vector<1x32xf32>
    %296 = vector.broadcast %295 : vector<1x32xf32> to vector<16x32xf32>
    %297 = arith.addf %293, %296 : vector<16x32xf32>
    %298 = arith.addf %208, %297 : vector<16x32xf32>
    %299 = vector.extract_strided_slice %298 {offsets = [0, 0], sizes = [8, 32], strides = [1, 1]} : vector<16x32xf32> to vector<8x32xf32>
    %c0_100 = arith.constant 0 : index
    %c0_101 = arith.constant 0 : index
    %c0_102 = arith.constant 0 : index
    %300 = vector.load %arg19[%c0_100, %c0_101, %c0_102] : memref<2x8x32xf32, #tpu.memory_space<vmem>>, vector<1x8x32xf32>
    %301 = vector.shape_cast %300 : vector<1x8x32xf32> to vector<8x32xf32>
    %302 = vector.shape_cast %299 : vector<8x32xf32> to vector<1x8x32xf32>
    tpu.vector_store %arg19[%c0_100, %c0_101, %c0_102], %302 {strides = array<i32>} : memref<2x8x32xf32, #tpu.memory_space<vmem>>, vector<1x8x32xf32>,
    %303 = vector.extract_strided_slice %298 {offsets = [8, 0], sizes = [8, 32], strides = [1, 1]} : vector<16x32xf32> to vector<8x32xf32>
    %c1_103 = arith.constant 1 : index
    %c0_104 = arith.constant 0 : index
    %c0_105 = arith.constant 0 : index
    %304 = vector.load %arg19[%c1_103, %c0_104, %c0_105] : memref<2x8x32xf32, #tpu.memory_space<vmem>>, vector<1x8x32xf32>
    %305 = vector.shape_cast %304 : vector<1x8x32xf32> to vector<8x32xf32>
    %306 = vector.shape_cast %303 : vector<8x32xf32> to vector<1x8x32xf32>
    tpu.vector_store %arg19[%c1_103, %c0_104, %c0_105], %306 {strides = array<i32>} : memref<2x8x32xf32, #tpu.memory_space<vmem>>, vector<1x8x32xf32>,
    %c1_i32 = arith.constant 1 : i32
    %307 = arith.cmpi eq, %arg1, %c1_i32 : i32
    %308 = arith.extui %307 : i1 to i32
    %c0_i32_106 = arith.constant 0 : i32
    %309 = arith.cmpi ne, %308, %c0_i32_106 : i32
    scf.if %309 {
      %310 = vector.extract_strided_slice %298 {offsets = [5, 0], sizes = [3, 32], strides = [1, 1]} : vector<16x32xf32> to vector<3x32xf32>
      %311 = vector.extract_strided_slice %298 {offsets = [13, 0], sizes = [3, 32], strides = [1, 1]} : vector<16x32xf32> to vector<3x32xf32>
      %312 = tpu.concatenate %310, %311 in 0 : vector<3x32xf32>, vector<3x32xf32> -> vector<6x32xf32>
      %c0_107 = arith.constant 0 : index
      %c0_108 = arith.constant 0 : index
      %313 = vector.load %arg14[%c0_107, %c0_108] : memref<1x32xf32, #tpu.memory_space<vmem>>, vector<1x32xf32>
      %c0_109 = arith.constant 0 : index
      %c0_110 = arith.constant 0 : index
      %314 = vector.load %arg15[%c0_109, %c0_110] : memref<1x32xf32, #tpu.memory_space<vmem>>, vector<1x32xf32>
      %cst_111 = arith.constant dense<0.000000e+00> : vector<6xf32>
      %315 = vector.multi_reduction <add>, %312, %cst_111 [1] : vector<6x32xf32> to vector<6xf32>
      %316 = vector.shape_cast %315 : vector<6xf32> to vector<6x1xf32>
      %cst_112 = arith.constant 3.200000e+01 : f32
      %317 = vector.broadcast %cst_112 : f32 to vector<6x1xf32>
      %318 = arith.divf %316, %317 : vector<6x1xf32>
      %319 = vector.broadcast %318 : vector<6x1xf32> to vector<6x32xf32>
      %320 = arith.subf %312, %319 : vector<6x32xf32>
      %321 = arith.mulf %320, %320 : vector<6x32xf32>
      %cst_113 = arith.constant dense<0.000000e+00> : vector<6xf32>
      %322 = vector.multi_reduction <add>, %321, %cst_113 [1] : vector<6x32xf32> to vector<6xf32>
      %323 = vector.shape_cast %322 : vector<6xf32> to vector<6x1xf32>
      %cst_114 = arith.constant 3.200000e+01 : f32
      %324 = vector.broadcast %cst_114 : f32 to vector<6x1xf32>
      %325 = arith.divf %323, %324 : vector<6x1xf32>
      %326 = vector.broadcast %318 : vector<6x1xf32> to vector<6x32xf32>
      %327 = arith.subf %312, %326 : vector<6x32xf32>
      %cst_115 = arith.constant 9.99999974E-6 : f32
      %328 = vector.broadcast %cst_115 : f32 to vector<6x1xf32>
      %329 = arith.addf %325, %328 : vector<6x1xf32>
      %330 = math.rsqrt %329 : vector<6x1xf32>
      %331 = vector.broadcast %330 : vector<6x1xf32> to vector<6x32xf32>
      %332 = arith.mulf %327, %331 : vector<6x32xf32>
      %333 = vector.broadcast %313 : vector<1x32xf32> to vector<6x32xf32>
      %334 = arith.mulf %332, %333 : vector<6x32xf32>
      %335 = vector.broadcast %314 : vector<1x32xf32> to vector<6x32xf32>
      %336 = arith.addf %334, %335 : vector<6x32xf32>
      %337 = arith.truncf %336 : vector<6x32xf32> to vector<6x32xbf16>
      %c0_116 = arith.constant 0 : index
      %c0_117 = arith.constant 0 : index
      %338 = vector.load %arg16[%c0_116, %c0_117] : memref<32x128xbf16, #tpu.memory_space<vmem>>, vector<32x128xbf16>
      %cst_118 = arith.constant dense<0.000000e+00> : vector<6x128xf32>
      %339 = tpu.matmul %337, %338, %cst_118 {dimension_numbers = #tpu.dot_dimension_numbers<[1], [0], [0], [1], [0, 0, 1, 1], [], []>} : vector<6x32xbf16>, vector<32x128xbf16>, vector<6x128xf32> -> vector<6x128xf32>
      %c0_119 = arith.constant 0 : index
      %c0_120 = arith.constant 0 : index
      %340 = vector.load %arg17[%c0_119, %c0_120] : memref<1x128xf32, #tpu.memory_space<vmem>>, vector<1x128xf32>
      %341 = vector.broadcast %340 : vector<1x128xf32> to vector<6x128xf32>
      %342 = arith.addf %339, %341 : vector<6x128xf32>
      %343 = vector.extract_strided_slice %342 {offsets = [0, 0], sizes = [3, 128], strides = [1, 1]} : vector<6x128xf32> to vector<3x128xf32>
      %c0_121 = arith.constant 0 : index
      %c0_122 = arith.constant 0 : index
      %c0_123 = arith.constant 0 : index
      %344 = vector.load %arg18[%c0_121, %c0_122, %c0_123] : memref<2x3x128xf32, #tpu.memory_space<vmem>>, vector<1x3x128xf32>
      %345 = vector.shape_cast %344 : vector<1x3x128xf32> to vector<3x128xf32>
      %346 = vector.shape_cast %343 : vector<3x128xf32> to vector<1x3x128xf32>
      tpu.vector_store %arg18[%c0_121, %c0_122, %c0_123], %346 {strides = array<i32>} : memref<2x3x128xf32, #tpu.memory_space<vmem>>, vector<1x3x128xf32>,
      %347 = vector.extract_strided_slice %342 {offsets = [3, 0], sizes = [3, 128], strides = [1, 1]} : vector<6x128xf32> to vector<3x128xf32>
      %c1_124 = arith.constant 1 : index
      %c0_125 = arith.constant 0 : index
      %c0_126 = arith.constant 0 : index
      %348 = vector.load %arg18[%c1_124, %c0_125, %c0_126] : memref<2x3x128xf32, #tpu.memory_space<vmem>>, vector<1x3x128xf32>
      %349 = vector.shape_cast %348 : vector<1x3x128xf32> to vector<3x128xf32>
      %350 = vector.shape_cast %347 : vector<3x128xf32> to vector<1x3x128xf32>
      tpu.vector_store %arg18[%c1_124, %c0_125, %c0_126], %350 {strides = array<i32>} : memref<2x3x128xf32, #tpu.memory_space<vmem>>, vector<1x3x128xf32>,
    } else {
    }
    return
  }
  func.func @transform_0(%arg0: i32, %arg1: i32) -> (i32, i32, i32) {
    %c0_i32 = arith.constant 0 : i32
    %c0_i32_0 = arith.constant 0 : i32
    %c0_i32_1 = arith.constant 0 : i32
    return %arg0, %c0_i32, %c0_i32_0 : i32, i32, i32
  }
  func.func @transform_1(%arg0: i32, %arg1: i32) -> (i32, i32, i32) {
    %c0_i32 = arith.constant 0 : i32
    %c0_i32_0 = arith.constant 0 : i32
    %c0_i32_1 = arith.constant 0 : i32
    return %arg1, %c0_i32, %c0_i32_0 : i32, i32, i32
  }
  func.func @transform_2(%arg0: i32, %arg1: i32) -> (i32, i32, i32) {
    %c0_i32 = arith.constant 0 : i32
    %c0_i32_0 = arith.constant 0 : i32
    %c0_i32_1 = arith.constant 0 : i32
    return %arg1, %c0_i32, %c0_i32_0 : i32, i32, i32
  }
  func.func @transform_3(%arg0: i32, %arg1: i32) -> (i32, i32, i32) {
    %c0_i32 = arith.constant 0 : i32
    %c0_i32_0 = arith.constant 0 : i32
    %c0_i32_1 = arith.constant 0 : i32
    return %arg1, %c0_i32, %c0_i32_0 : i32, i32, i32
  }
  func.func @transform_4(%arg0: i32, %arg1: i32) -> (i32, i32, i32) {
    %c0_i32 = arith.constant 0 : i32
    %c0_i32_0 = arith.constant 0 : i32
    %c0_i32_1 = arith.constant 0 : i32
    return %arg1, %c0_i32, %c0_i32_0 : i32, i32, i32
  }
  func.func @transform_5(%arg0: i32, %arg1: i32) -> (i32, i32, i32) {
    %c0_i32 = arith.constant 0 : i32
    %c0_i32_0 = arith.constant 0 : i32
    %c0_i32_1 = arith.constant 0 : i32
    return %arg1, %c0_i32, %c0_i32_0 : i32, i32, i32
  }
  func.func @transform_6(%arg0: i32, %arg1: i32) -> (i32, i32, i32) {
    %c0_i32 = arith.constant 0 : i32
    %c0_i32_0 = arith.constant 0 : i32
    %c0_i32_1 = arith.constant 0 : i32
    return %arg1, %c0_i32, %c0_i32_0 : i32, i32, i32
  }
  func.func @transform_7(%arg0: i32, %arg1: i32) -> (i32, i32, i32) {
    %c0_i32 = arith.constant 0 : i32
    %c0_i32_0 = arith.constant 0 : i32
    %c0_i32_1 = arith.constant 0 : i32
    return %arg1, %c0_i32, %c0_i32_0 : i32, i32, i32
  }
  func.func @transform_8(%arg0: i32, %arg1: i32) -> (i32, i32, i32) {
    %c0_i32 = arith.constant 0 : i32
    %c0_i32_0 = arith.constant 0 : i32
    %c0_i32_1 = arith.constant 0 : i32
    return %arg1, %c0_i32, %c0_i32_0 : i32, i32, i32
  }
  func.func @transform_9(%arg0: i32, %arg1: i32) -> (i32, i32, i32) {
    %c0_i32 = arith.constant 0 : i32
    %c0_i32_0 = arith.constant 0 : i32
    %c0_i32_1 = arith.constant 0 : i32
    return %arg1, %c0_i32, %c0_i32_0 : i32, i32, i32
  }
  func.func @transform_10(%arg0: i32, %arg1: i32) -> (i32, i32, i32) {
    %c0_i32 = arith.constant 0 : i32
    %c0_i32_0 = arith.constant 0 : i32
    %c0_i32_1 = arith.constant 0 : i32
    return %arg1, %c0_i32, %c0_i32_0 : i32, i32, i32
  }
  func.func @transform_11(%arg0: i32, %arg1: i32) -> (i32, i32, i32) {
    %c0_i32 = arith.constant 0 : i32
    %c0_i32_0 = arith.constant 0 : i32
    %c0_i32_1 = arith.constant 0 : i32
    return %arg1, %c0_i32, %c0_i32_0 : i32, i32, i32
  }
  func.func @transform_12(%arg0: i32, %arg1: i32) -> (i32, i32) {
    %c0_i32 = arith.constant 0 : i32
    %c0_i32_0 = arith.constant 0 : i32
    %c0_i32_1 = arith.constant 0 : i32
    return %c0_i32, %c0_i32_0 : i32, i32
  }
  func.func @transform_13(%arg0: i32, %arg1: i32) -> (i32, i32) {
    %c0_i32 = arith.constant 0 : i32
    %c0_i32_0 = arith.constant 0 : i32
    %c0_i32_1 = arith.constant 0 : i32
    return %c0_i32, %c0_i32_0 : i32, i32
  }
  func.func @transform_14(%arg0: i32, %arg1: i32) -> (i32, i32) {
    %c0_i32 = arith.constant 0 : i32
    %c0_i32_0 = arith.constant 0 : i32
    %c0_i32_1 = arith.constant 0 : i32
    return %c0_i32, %c0_i32_0 : i32, i32
  }
  func.func @transform_15(%arg0: i32, %arg1: i32) -> (i32, i32) {
    %c0_i32 = arith.constant 0 : i32
    %c0_i32_0 = arith.constant 0 : i32
    %c0_i32_1 = arith.constant 0 : i32
    return %c0_i32, %c0_i32_0 : i32, i32
  }
  func.func @transform_16(%arg0: i32, %arg1: i32) -> (i32, i32, i32) {
    %c0_i32 = arith.constant 0 : i32
    %c0_i32_0 = arith.constant 0 : i32
    %c0_i32_1 = arith.constant 0 : i32
    return %arg0, %c0_i32, %c0_i32_0 : i32, i32, i32
  }
}

</mosaic_0001>

<bundles_post_ra>
// kernel: tpu_custom_call.1
= control target key start
LH: loop header
LB: loop body
LE: loop exit
PB: predicated region body
PF: predicated region fallthrough
CT: control target
= control target key end

     0   :  { %s2223_s21 = smov 0   ;;  %s2225_s22 = smov 0   ;;  %s2543_s0 = inlined_call_operand.vmem [shape: f32[2,8,32], index: 0, kind: input, shape index: {}]   ;;  %s2544_s1 = inlined_call_operand.vmem [shape: f32[2,1,32], index: 1, kind: input, shape index: {}]   ;;  %s2545_s2 = inlined_call_operand.vmem [shape: f32[2,1,32], index: 2, kind: input, shape index: {}]   ;;  %s2546_s3 = inlined_call_operand.vmem [shape: bf16[2,32,96], index: 3, kind: input, shape index: {}]   ;;  %s2547_s4 = inlined_call_operand.vmem [shape: bf16[2,32,32], index: 4, kind: input, shape index: {}]   ;;  %s2548_s5 = inlined_call_operand.vmem [shape: f32[2,1,32], index: 5, kind: input, shape index: {}]   ;;  %s2549_s6 = inlined_call_operand.vmem [shape: f32[2,1,32], index: 6, kind: input, shape index: {}]   ;;  %s2550_s7 = inlined_call_operand.vmem [shape: f32[2,1,32], index: 7, kind: input, shape index: {}]   ;;  %s2551_s8 = inlined_call_operand.vmem [shape: bf16[2,32,128], index: 8, kind: input, shape index: {}]   ;;  %s2552_s9 = inlined_call_operand.vmem [shape: f32[2,1,128], index: 9, kind: input, shape index: {}]   ;;  %s2553_s10 = inlined_call_operand.vmem [shape: bf16[2,128,32], index: 10, kind: input, shape index: {}]   ;;  %s2554_s11 = inlined_call_operand.vmem [shape: f32[2,1,32], index: 11, kind: input, shape index: {}]   ;;  %s2555_s12 = inlined_call_operand.vmem [shape: f32[1,32], index: 12, kind: input, shape index: {}]   ;;  %s2556_s13 = inlined_call_operand.vmem [shape: f32[1,32], index: 13, kind: input, shape index: {}]   ;;  %s2557_s14 = inlined_call_operand.vmem [shape: bf16[32,128], index: 14, kind: input, shape index: {}]   ;;  %s2558_s15 = inlined_call_operand.vmem [shape: f32[1,128], index: 15, kind: input, shape index: {}]   ;;  %s2559_s16 = inlined_call_operand.vmem [shape: f32[2,3,128], index: 16, kind: output, shape index: {}]  }
   0x1   :  { %2564 = sst [smem:[#allocation6_spill]] %s2543_s0  ;;  %s2227_s23 = smov 0  }
   0x2   :  { %2565 = sst [smem:[#allocation7_spill]] %s2546_s3 }
   0x3   :  { %2566 = sst [smem:[#allocation8_spill]] %s2547_s4 }
   0x4   :  { %2567 = sst [smem:[#allocation9_spill]] %s2555_s12 }
   0x5   :  { %2568 = sst [smem:[#allocation10_spill]] %s2556_s13 }
   0x6   :  { %2569 = sst [smem:[#allocation11_spill]] %s2558_s15 }
   0x7   :  { %2570 = sst [smem:[#allocation12_spill]] %s2559_s16 }
   0x8 LB: > { %2571 = sst [smem:[#allocation3_spill]] %s2117_s22  ;;  %s35_s24 = sadd.s32 1, %s2117_s22  ;;  %s2121_s23 = sphi %s2227_s23, %s26_s23   ;;  %s2117_s22 = sphi %s2225_s22, %s2587_s22   ;;  %s2113_s21 = sphi %s2223_s21, %s2586_s21  }
   0x9   : > { %2572 = sst [smem:[#allocation4_spill]] %s2121_s23  ;;  %p1880_p0 = scmp.ge.s32.totalorder %s2121_s23, 1 }
   0xa   : > { %p36_p1 = scmp.ge.s32.totalorder %s35_s24, 2  ;;  %p571_p2 = scmp.lt.s32.totalorder %s2121_s23, 3 }
   0xc   : > { %s2589_s24 = smov (%p36_p1, %s35_s24), 0  ;;  %p572_p3 = pnand %p1880_p0, %p571_p2 }
   0xd   : > { %2573 = sst [smem:[#allocation5_spill]] %s2589_s24  ;;  %p668_p4 = scmp.lt.s32.totalorder (!%p572_p3), %s2113_s21, 1 }
   0xe   : > { %575 = sbr.rel (%p572_p3) target bundleno = 2808 (0xaf8), region = 84  ;;  %s2574_s3 = sld [smem:[#allocation7_spill]] (!%p572_p3) }
   0xf   : > { %s2575_s4 = sld [smem:[#allocation8_spill]] (!%p572_p3)  ;;  %p1889_p5 = scmp.ne.s32.totalorder (!%p572_p3), %s2113_s21, 0 }
  0x13   : > { %s2245_s25 = scalar_select %p668_p4, %s2113_s21, 1 }
  0x14   : > { %s2576_s30 = sld [smem:[#allocation6_spill]] (!%p1889_p5) }
  0x15   : > { %s1982_s17 = sshll.u32 %s2245_s25, 4  ;;  %s692_s13 = scalar_lea.vmem %s2550_s7, %s2245_s25 }
  0x16   : > { %s2263_s27 = scalar_lea.vmem %s2574_s3, %s1982_s17  ;;  %s2268_s16 = scalar_lea.vmem %s2575_s4, %s1982_s17 }
  0x17   : > { %s2281_s20 = scalar_lea.vmem %s2551_s8, %s1982_s17  ;;  %s700_s3 = scalar_lea.vmem %s2552_s9, %s2245_s25 }
  0x18   : > { %s1985_s22 = sshll.u32 %s2245_s25, 6  ;;  %s708_s12 = scalar_lea.vmem %s2554_s11, %s2245_s25 }
  0x19   : > { %s2295_s29 = scalar_lea.vmem %s2553_s10, %s1985_s22  ;;  %719 = sbr.rel (%p1889_p5) target bundleno = 33 (0x21), region = 88 }
  0x1e   : > { %v720_v0 = vld [vmem:[%s2576_s30] sm:$0xff]  ;;  %vm722_vm0 = vcmask 261120   ;;  %v721_v1 = vld [vmem:[%s2576_s30 + $0x8] sm:$0xff] }
  0x1f   : > { %723 = vst.msk [vmem:[#allocation2] sm:$0xff] %vm722_vm0, %v720_v0 }
  0x20   : > { %724 = vst.msk [vmem:[#allocation2 + $0x8] sm:$0xff] %vm722_vm0, %v721_v1 }
  0x21 PF: > { %vm730_vm1 = vcmask 261120   ;;  %v2123_v6 = vmov 32.0   ;;  %v1987_v23 = vld [vmem:[%s2263_s27 + $0x8] sm:$0xff]  ;;  %v1986_v25 = vld [vmem:[%s2263_s27] sm:$0xff]  ;;  %s2577_s24 = scalar_lea.vmem %s2544_s1, %s2245_s25  ;;  %s2578_s23 = scalar_lea.vmem %s2545_s2, %s2245_s25  ;;  %vm830_vm9 = vcmask 64512   ;;  %vm867_vm10 = vcmask 1043456  }
  0x22   : > { %2048 = vrcp.f32 %v2123_v6  ;;  %818 = vmatpush.bf16.msra.mxu0 %v1987_v23  ;;  %v2041_v44 = vld [vmem:[%s2577_s24] ss:$0 sm:$0xff]  ;;  %s2124_s15 = smov 88   ;;  %s2125_s28 = smov 64   ;;  %vm1074_vm11 = vcmask 130048   ;;  %vm1077_vm12 = vcmask 195584  }
  0x23   : > { %v2042_v49 = vld [vmem:[%s2578_s23] ss:$0 sm:$0xff]  ;;  %s2126_s0 = smov 96   ;;  %s2127_s17 = smov 120  }
  0x24   : > { %s2128_s18 = smov 104   ;;  %s2129_s19 = smov 112  }
  0x25   : > { %s2130_s4 = smov 80   ;;  %s2131_s27 = smov 72  }
  0x26   : > { %v2304_v2 = vld [vmem:[#allocation2] sm:$0xff]  ;;  %819 = vmatpush.bf16.msra.mxu0 %v1986_v25  ;;  %s2132_s24 = smov 48   ;;  %s2133_s26 = smov 56  }
  0x27   : > { %v731_v3 = vsel %vm730_vm1, %v2304_v2, 0.0  ;;  %v2308_v4 = vld [vmem:[#allocation2 + $0x8] sm:$0xff]  ;;  %s2134_s22 = smov 40   ;;  %s2135_s23 = smov 8  }
  0x28   : > { %732 = vadd.xlane.f32.xlu0 %v731_v3  ;;  %v734_v5 = vsel %vm730_vm1, %v2308_v4, 0.0  ;;  %v2049_v7 = vpop.eup %2048  ;;  %p1967_p6 = scmp.ne.s32.totalorder %s2113_s21, 1 }
  0x29   : > { %v738_v8 = vmul.f32 32.0, %v2049_v7  ;;  %vm742_vm2 = vweird.f32 %v2049_v7 }
  0x2b   : > { %v739_v9 = vsub.f32 1.0, %v738_v8 }
  0x2d   : > { %v740_v10 = vmul.f32 %v2049_v7, %v739_v9 }
  0x2f   : > { %v741_v11 = vadd.f32 %v2049_v7, %v740_v10 }
  0x30   : > { %735 = vadd.xlane.f32.xlu0 %v734_v5 }
  0x31   : > { %v2312_v12 = vsel %vm742_vm2, %v2049_v7, %v741_v11 }
  0x9b   : > { %v733_v13 = vpop.xlane.xlu0 %732 }
  0x9c   : > { %v744_v14 = vmul.f32 %v2312_v12, %v733_v13 }
  0x9e   : > { %v746_v15 = vsub.f32 %v2304_v2, %v744_v14 }
  0xa0   : > { %v748_v16 = vmul.f32 %v746_v15, %v746_v15 }
  0xa2   : > { %v750_v17 = vsel %vm730_vm1, %v748_v16, 0.0 }
  0xa3   : > { %751 = vadd.xlane.f32.xlu1 %v750_v17  ;;  %v736_v18 = vpop.xlane.xlu0 %735 }
  0xa4   : > { %v745_v19 = vmul.f32 %v2312_v12, %v736_v18 }
  0xa6   : > { %v747_v20 = vsub.f32 %v2308_v4, %v745_v19 }
  0xa8   : > { %v749_v21 = vmul.f32 %v747_v20, %v747_v20 }
  0xaa   : > { %v753_v22 = vsel %vm730_vm1, %v749_v21, 0.0 }
  0xab   : > { %754 = vadd.xlane.f32.xlu1 %v753_v22 }
 0x116   : > { %v752_v24 = vpop.xlane.xlu1 %751 }
 0x117   : > { %v756_v26 = vmul.f32 %v752_v24, %v2312_v12 }
 0x119   : > { %v758_v27 = vadd.f32 1e-05, %v756_v26 }
 0x11b   : > { %2050 = vrsqrt.f32 %v758_v27  ;;  %vm766_vm4 = vweird.f32 %v758_v27 }
 0x11e   : > { %v755_v28 = vpop.xlane.xlu1 %754 }
 0x11f   : > { %v757_v29 = vmul.f32 %v755_v28, %v2312_v12 }
 0x121   : > { %v2051_v30 = vpop.eup %2050  ;;  %v759_v31 = vadd.f32 1e-05, %v757_v29 }
 0x122   : > { %v761_v32 = vmul.f32 %v2051_v30, %v758_v27  ;;  %vm767_vm3 = vweird.f32 %v2051_v30 }
 0x123   : > { %2052 = vrsqrt.f32 %v759_v31  ;;  %vm768_vm5 = vmor %vm766_vm4, %vm767_vm3  ;;  %vm776_vm7 = vweird.f32 %v759_v31 }
 0x124   : > { %v762_v33 = vmul.f32 %v2051_v30, %v761_v32 }
 0x126   : > { %v763_v34 = vmul.f32 0.5, %v762_v33 }
 0x128   : > { %v764_v35 = vsub.f32 1.5, %v763_v34 }
 0x129   : > { %v2053_v36 = vpop.eup %2052 }
 0x12a   : > { %v765_v37 = vmul.f32 %v2051_v30, %v764_v35  ;;  %v771_v38 = vmul.f32 %v2053_v36, %v759_v31  ;;  %vm777_vm6 = vweird.f32 %v2053_v36 }
 0x12b   : > { %vm778_vm8 = vmor %vm776_vm7, %vm777_vm6 }
 0x12c   : > { %v772_v39 = vmul.f32 %v2053_v36, %v771_v38  ;;  %v769_v40 = vsel %vm768_vm5, %v2051_v30, %v765_v37 }
 0x12d   : > { %v780_v43 = vmul.f32 %v769_v40, %v746_v15 }
 0x12e   : > { %v773_v41 = vmul.f32 0.5, %v772_v39 }
 0x12f   : > { %v785_v48 = vmul.f32 %v2041_v44, %v780_v43 }
 0x130   : > { %v774_v42 = vsub.f32 1.5, %v773_v41 }
 0x131   : > { %v790_v51 = vadd.f32 %v2042_v49, %v785_v48 }
 0x132   : > { %v775_v45 = vmul.f32 %v2053_v36, %v774_v42 }
 0x134   : > { %v779_v46 = vsel %vm778_vm8, %v2053_v36, %v775_v45 }
 0x135   : > { %v781_v47 = vmul.f32 %v779_v46, %v747_v20 }
 0x137   : > { %v786_v50 = vmul.f32 %v2041_v44, %v781_v47 }
 0x139   : > { %v791_v52 = vadd.f32 %v2042_v49, %v786_v50 }
 0x13b   : > { %v792_v53 = vpack.c.bf16 %v791_v52, %v790_v51 }
 0x13d   : > { %1898 = vmatmul.msk.bf16.vlgmr.msra.gmra.mxu0 %vm730_vm1, %v792_v53 }
 0x1ba   : > { %v821_v54 = vpop.f32.mrf.mxu0 }
 0x1bb   : > { %v2335_v55 = vpack.c.bf16 %v821_v54, %v821_v54 }
 0x1bd   : > { %887 = vrot.lane.b32.xlu0 %v2335_v55, %s2124_s15  ;;  %862 = vrot.lane.b32.xlu1 %v2335_v55, %s2125_s28 }
 0x1be   : > { %828 = vrot.lane.b32.xlu2 %v2335_v55, %s2126_s0 }
 0x1c2   : > { %v823_v56 = vpop.f32.mrf.mxu0 }
 0x1c3   : > { %v2347_v57 = vpack.c.bf16 %v823_v56, %v823_v56 }
 0x1c5   : > { %885 = vrot.lane.b32.xlu1 %v2335_v55, %s2127_s17 }
 0x1cd   : > { %999 = vrot.lane.b32.xlu1 %v2335_v55, %s2128_s18 }
 0x1d5   : > { %942 = vrot.lane.b32.xlu1 %v2335_v55, %s2129_s19 }
 0x1dd   : > { %1082 = vrot.lane.b32.xlu1 %v2347_v57, %s2126_s0  ;;  %s2582_s0 = sld [smem:[#allocation10_spill]] (!%p1967_p6) }
 0x1e5   : > { %1251 = vrot.lane.b32.xlu1 %v2347_v57, %s2128_s18  ;;  %s2583_s18 = sld [smem:[#allocation11_spill]] (!%p1967_p6) }
 0x218   : > { %v829_v58 = vpop.permute.xlu2 %828 }
 0x219   : > { %v835_v59 = vsel %vm830_vm9, %v829_v58, 0 }
 0x21a   : > { %844 = vmatpush.bf16.xpose.msra.mxu1 %v835_v59 }
 0x221   : > { %1899 = vmatmul.msk.bf16.vlgmr.msra.gmra.mxu1 %vm830_vm9, %v2335_v55 }
 0x22f   : > { %v888_v60 = vpop.permute.xlu0 %887  ;;  %v863_v61 = vpop.permute.xlu1 %862 }
 0x230   : > { %v869_v62 = vsel %vm867_vm10, %v863_v61, 0  ;;  %v893_v63 = vsel %vm830_vm9, %v888_v60, 0 }
 0x231   : > { %878 = vmatpush.bf16.msra.mxu2 %v869_v62 }
 0x235   : > { %902 = vmatpush.bf16.xpose.msrb.mxu2 %v893_v63 }
 0x237   : > { %v886_v5 = vpop.permute.xlu1 %885 }
 0x23f   : > { %v1000_v6 = vpop.permute.xlu1 %999 }
 0x247   : > { %v943_v7 = vpop.permute.xlu1 %942 }
 0x24f   : > { %v1083_v11 = vpop.permute.xlu1 %1082 }
 0x250   : > { %v1088_v15 = vsel %vm830_vm9, %v1083_v11, 0 }
 0x257   : > { %v1252_v37 = vpop.permute.xlu1 %1251 }
 0x29e   : > { %v846_v0 = vpop.f32.mrf.mxu1 }
 0x29f   : > { %v850_v1 = vsel %vm830_vm9, %v846_v0, -inf }
 0x2a0   : > { %851 = vmax.xlane.f32.xlu2 %v850_v1 }
 0x2a6   : > { %v848_v3 = vpop.f32.mrf.mxu1 }
 0x2b8   : > { %944 = vrot.lane.b32.xlu2 %v2335_v55, %s2130_s4 }
 0x2c0   : > { %1196 = vrot.lane.b32.xlu2 %v2347_v57, %s2130_s4 }
 0x313   : > { %v852_v8 = vpop.xlane.xlu2 %851 }
 0x314   : > { %v853_v9 = vsub.f32 %v846_v0, %v852_v8 }
 0x316   : > { %v854_v10 = vmul.f32 1.442695, %v853_v9 }
 0x318   : > { %2054 = vpow2.f32 %v854_v10 }
 0x31b   : > { %v945_v13 = vpop.permute.xlu2 %944 }
 0x31c   : > { %v950_v14 = vsel %vm830_vm9, %v945_v13, 0 }
 0x31d   : > { %959 = vmatpush.bf16.xpose.msrb.mxu0 %v950_v14 }
 0x31e   : > { %v2055_v16 = vpop.eup %2054 }
 0x31f   : > { %v856_v17 = vsel %vm830_vm9, %v2055_v16, 0.0 }
 0x320   : > { %857 = vadd.xlane.f32.xlu0 %v856_v17 }
 0x323   : > { %v1197_v18 = vpop.permute.xlu2 %1196 }
 0x324   : > { %v1202_v19 = vsel %vm830_vm9, %v1197_v18, 0  ;;  %1903 = vmatmul.msk.bf16.vlgmr.msrb.gmra.mxu0 %vm830_vm9, %v943_v7 }
 0x325   : > { %1097 = vmatpush.bf16.xpose.msra.mxu0 %v1088_v15 }
 0x32d   : > { %1211 = vmatpush.bf16.xpose.msrb.mxu0 %v1202_v19 }
 0x334   : > { %1001 = vrot.lane.b32.xlu0 %v2335_v55, %s2131_s27  ;;  %1907 = vmatmul.msk.bf16.vlgmr.msra.gmra.mxu0 %vm830_vm9, %v2347_v57 }
 0x33c   : > { %1139 = vrot.lane.b32.xlu0 %v2347_v57, %s2124_s15  ;;  %s2136_s15 = smov 16  }
 0x344   : > { %1137 = vrot.lane.b32.xlu0 %v2347_v57, %s2127_s17  ;;  %s2579_s17 = scalar_lea.vmem %s2548_s5, %s2245_s25 }
 0x34c   : > { %1253 = vrot.lane.b32.xlu0 %v2347_v57, %s2131_s27  ;;  %s2584_s27 = sld [smem:[#allocation12_spill]] (!%p1967_p6) }
 0x354   : > { %1194 = vrot.lane.b32.xlu0 %v2347_v57, %s2129_s19  ;;  %s2580_s19 = scalar_lea.vmem %s2549_s6, %s2245_s25 }
 0x393   : > { %v858_v20 = vpop.xlane.xlu0 %857 }
 0x394   : > { %2056 = vrcp.f32 %v858_v20 }
 0x39a   : > { %v2057_v21 = vpop.eup %2056 }
 0x39b   : > { %v860_v22 = vmul.f32 %v2057_v21, %v2055_v16 }
 0x39d   : > { %v861_v23 = vpack.c.bf16 %v860_v22, %v860_v22 }
 0x39f   : > { %1900 = vmatmul.msk.bf16.vlgmr.msra.gmra.mxu2 %vm830_vm9, %v861_v23 }
 0x3a1   : > { %v961_v24 = vpop.f32.mrf.mxu0 }
 0x3a2   : > { %v965_v25 = vsel %vm830_vm9, %v961_v24, -inf }
 0x3a3   : > { %966 = vmax.xlane.f32.xlu0 %v965_v25 }
 0x3a6   : > { %v1002_v26 = vpop.permute.xlu0 %1001 }
 0x3a7   : > { %v1007_v27 = vsel %vm830_vm9, %v1002_v26, 0 }
 0x3a8   : > { %1016 = vmatpush.bf16.xpose.msra.mxu3 %v1007_v27 }
 0x3a9   : > { %v963_v28 = vpop.f32.mrf.mxu0 }
 0x3ae   : > { %v1140_v29 = vpop.permute.xlu0 %1139 }
 0x3af   : > { %1901 = vmatmul.msk.bf16.vlgmr.msrb.gmra.mxu2 %vm830_vm9, %v886_v5  ;;  %1905 = vmatmul.msk.bf16.vlgmr.msra.gmra.mxu3 %vm830_vm9, %v1000_v6  ;;  %v1145_v30 = vsel %vm830_vm9, %v1140_v29, 0 }
 0x3b0   : > { %1154 = vmatpush.bf16.xpose.msrb.mxu3 %v1145_v30 }
 0x3b1   : > { %v2380_v31 = vpop.f32.mrf.mxu0 }
 0x3b2   : > { %v1103_v47 = vsel %vm830_vm9, %v2380_v31, -inf }
 0x3b6   : > { %v1138_v32 = vpop.permute.xlu0 %1137 }
 0x3b9   : > { %v1101_v33 = vpop.f32.mrf.mxu0 }
 0x3be   : > { %v1254_v34 = vpop.permute.xlu0 %1253 }
 0x3bf   : > { %v1259_v35 = vsel %vm830_vm9, %v1254_v34, 0  ;;  %1909 = vmatmul.msk.bf16.vlgmr.msrb.gmra.mxu3 %vm830_vm9, %v1138_v32 }
 0x3c0   : > { %1268 = vmatpush.bf16.xpose.msra.mxu3 %v1259_v35 }
 0x3c6   : > { %v1195_v36 = vpop.permute.xlu0 %1194 }
 0x3c7   : > { %1911 = vmatmul.msk.bf16.vlgmr.msrb.gmra.mxu0 %vm830_vm9, %v1195_v36 }
 0x3cf   : > { %1913 = vmatmul.msk.bf16.vlgmr.msra.gmra.mxu3 %vm830_vm9, %v1252_v37 }
 0x416   : > { %v967_v44 = vpop.xlane.xlu0 %966 }
 0x417   : > { %v968_v48 = vsub.f32 %v961_v24, %v967_v44 }
 0x419   : > { %v969_v49 = vmul.f32 1.442695, %v968_v48 }
 0x41b   : > { %2058 = vpow2.f32 %v969_v49 }
 0x421   : > { %v2059_v54 = vpop.eup %2058 }
 0x422   : > { %v2386_v38 = vpop.f32.mrf.mxu2  ;;  %v971_v59 = vsel %vm830_vm9, %v2059_v54, 0.0 }
 0x42a   : > { %v882_v39 = vpop.f32.mrf.mxu2 }
 0x432   : > { %v904_v40 = vpop.f32.mrf.mxu2  ;;  %v1018_v41 = vpop.f32.mrf.mxu3 }
 0x433   : > { %v1022_v42 = vsel %vm830_vm9, %v1018_v41, -inf  ;;  %v908_v43 = vsel %vm830_vm9, %v904_v40, -inf }
 0x434   : > { %1023 = vmax.xlane.f32.xlu2 %v1022_v42  ;;  %909 = vmax.xlane.f32.xlu1 %v908_v43 }
 0x43a   : > { %v906_v45 = vpop.f32.mrf.mxu2  ;;  %v1020_v46 = vpop.f32.mrf.mxu3 }
 0x43c   : > { %1104 = vmax.xlane.f32.xlu1 %v1103_v47 }
 0x442   : > { %v1156_v50 = vpop.f32.mrf.mxu3 }
 0x443   : > { %v1160_v51 = vsel %vm830_vm9, %v1156_v50, -inf }
 0x444   : > { %1161 = vmax.xlane.f32.xlu2 %v1160_v51  ;;  %v1213_v52 = vpop.f32.mrf.mxu0 }
 0x445   : > { %v1217_v53 = vsel %vm830_vm9, %v1213_v52, -inf }
 0x446   : > { %1218 = vmax.xlane.f32.xlu1 %v1217_v53 }
 0x44a   : > { %v1158_v56 = vpop.f32.mrf.mxu3 }
 0x44c   : > { %v1215_v58 = vpop.f32.mrf.mxu0 }
 0x44e   : > { %972 = vadd.xlane.f32.xlu1 %v971_v59 }
 0x452   : > { %v1270_v60 = vpop.f32.mrf.mxu3 }
 0x453   : > { %v1274_v61 = vsel %vm830_vm9, %v1270_v60, -inf }
 0x454   : > { %1275 = vmax.xlane.f32.xlu0 %v1274_v61 }
 0x45a   : > { %v1272_v62 = vpop.f32.mrf.mxu3 }
 0x467   : > { %977 = vrot.lane.b32.xlu1 %v2335_v55, %s2132_s24 }
 0x468   : > { %920 = vrot.lane.b32.xlu0 %v2335_v55, %s2133_s26 }
 0x46f   : > { %1172 = vrot.lane.b32.xlu1 %v2347_v57, %s2133_s26 }
 0x477   : > { %1115 = vrot.lane.b32.xlu1 %v2347_v57, %s2125_s28  ;;  %s2137_s28 = smov 24  }
 0x4a7   : > { %v1024_v63 = vpop.xlane.xlu2 %1023  ;;  %v910_v0 = vpop.xlane.xlu1 %909 }
 0x4a8   : > { %v1025_v1 = vsub.f32 %v1018_v41, %v1024_v63  ;;  %v911_v5 = vsub.f32 %v904_v40, %v910_v0 }
 0x4aa   : > { %v1026_v3 = vmul.f32 1.442695, %v1025_v1  ;;  %v912_v6 = vmul.f32 1.442695, %v911_v5 }
 0x4ac   : > { %2060 = vpow2.f32 %v1026_v3 }
 0x4ad   : > { %2062 = vpow2.f32 %v912_v6 }
 0x4af   : > { %v1105_v7 = vpop.xlane.xlu1 %1104 }
 0x4b0   : > { %v1106_v40 = vsub.f32 %v2380_v31, %v1105_v7 }
 0x4b2   : > { %v2402_v8 = vpop.eup %2060  ;;  %v1107_v41 = vmul.f32 1.442695, %v1106_v40 }
 0x4b3   : > { %v1028_v9 = vsel %vm830_vm9, %v2402_v8, 0.0  ;;  %v2063_v11 = vpop.eup %2062 }
 0x4b4   : > { %1029 = vadd.xlane.f32.xlu2 %v1028_v9  ;;  %v914_v17 = vsel %vm830_vm9, %v2063_v11, 0.0 }
 0x4b7   : > { %v1162_v10 = vpop.xlane.xlu2 %1161 }
 0x4b8   : > { %v1163_v13 = vsub.f32 %v1156_v50, %v1162_v10 }
 0x4b9   : > { %v1219_v14 = vpop.xlane.xlu1 %1218 }
 0x4ba   : > { %v1164_v15 = vmul.f32 1.442695, %v1163_v13  ;;  %v1220_v16 = vsub.f32 %v1213_v52, %v1219_v14 }
 0x4bc   : > { %2064 = vpow2.f32 %v1164_v15  ;;  %915 = vadd.xlane.f32.xlu2 %v914_v17  ;;  %v1221_v18 = vmul.f32 1.442695, %v1220_v16 }
 0x4be   : > { %2066 = vpow2.f32 %v1221_v18 }
 0x4c1   : > { %v973_v26 = vpop.xlane.xlu1 %972 }
 0x4c2   : > { %v2407_v19 = vpop.eup %2064 }
 0x4c3   : > { %v1166_v20 = vsel %vm830_vm9, %v2407_v19, 0.0 }
 0x4c4   : > { %1167 = vadd.xlane.f32.xlu0 %v1166_v20  ;;  %v2411_v22 = vpop.eup %2066 }
 0x4c5   : > { %v1223_v25 = vsel %vm830_vm9, %v2411_v22, 0.0 }
 0x4c7   : > { %v1276_v21 = vpop.xlane.xlu0 %1275 }
 0x4c8   : > { %v1277_v23 = vsub.f32 %v1270_v60, %v1276_v21 }
 0x4ca   : > { %v1278_v24 = vmul.f32 1.442695, %v1277_v23 }
 0x4cc   : > { %2068 = vpow2.f32 %v1278_v24  ;;  %1224 = vadd.xlane.f32.xlu0 %v1223_v25 }
 0x4cd   : > { %2070 = vrcp.f32 %v973_v26 }
 0x4ce   : > { %2072 = vpow2.f32 %v1107_v41 }
 0x4d2   : > { %v2069_v27 = vpop.eup %2068 }
 0x4d3   : > { %v1280_v28 = vsel %vm830_vm9, %v2069_v27, 0.0  ;;  %v2071_v29 = vpop.eup %2070 }
 0x4d4   : > { %1034 = vrot.lane.b32.xlu2 %v2335_v55, %s2134_s22  ;;  %1281 = vadd.xlane.f32.xlu1 %v1280_v28  ;;  %v975_v30 = vmul.f32 %v2071_v29, %v2059_v54  ;;  %v2073_v42 = vpop.eup %2072 }
 0x4d5   : > { %v1109_v43 = vsel %vm830_vm9, %v2073_v42, 0.0 }
 0x4d6   : > { %v976_v36 = vpack.c.bf16 %v975_v30, %v975_v30 }
 0x4d9   : > { %v978_v32 = vpop.permute.xlu1 %977 }
 0x4da   : > { %v921_v33 = vpop.permute.xlu0 %920  ;;  %v983_v34 = vsel %vm867_vm10, %v978_v32, 0 }
 0x4db   : > { %v926_v35 = vsel %vm867_vm10, %v921_v33, 0  ;;  %992 = vmatpush.bf16.msrb.mxu1 %v983_v34 }
 0x4dc   : > { %935 = vmatpush.bf16.msra.mxu2 %v926_v35 }
 0x4de   : > { %1904 = vmatmul.msk.bf16.vlgmr.msrb.gmra.mxu1 %vm830_vm9, %v976_v36 }
 0x4e0   : > { %1286 = vrot.lane.b32.xlu0 %v2347_v57, %s2134_s22 }
 0x4e1   : > { %v1173_v37 = vpop.permute.xlu1 %1172 }
 0x4e2   : > { %v1178_v31 = vsel %vm867_vm10, %v1173_v37, 0 }
 0x4e9   : > { %v1116_v39 = vpop.permute.xlu1 %1115 }
 0x4ea   : > { %v1121_v55 = vsel %vm867_vm10, %v1116_v39, 0 }
 0x4eb   : > { %1130 = vmatpush.bf16.msra.mxu1 %v1121_v55 }
 0x4fd   : > { %1110 = vadd.xlane.f32.xlu2 %v1109_v43 }
 0x515   : > { %1229 = vrot.lane.b32.xlu2 %v2347_v57, %s2132_s24 }
 0x527   : > { %v1030_v44 = vpop.xlane.xlu2 %1029 }
 0x52f   : > { %v916_v45 = vpop.xlane.xlu2 %915 }
 0x530   : > { %2074 = vrcp.f32 %v916_v45 }
 0x531   : > { %2076 = vrcp.f32 %v1030_v44 }
 0x536   : > { %v2075_v46 = vpop.eup %2074 }
 0x537   : > { %v918_v47 = vmul.f32 %v2075_v46, %v2063_v11  ;;  %v1035_v48 = vpop.permute.xlu2 %1034  ;;  %v1168_v51 = vpop.xlane.xlu0 %1167 }
 0x538   : > { %v1040_v49 = vsel %vm867_vm10, %v1035_v48, 0  ;;  %v2077_v52 = vpop.eup %2076  ;;  %2078 = vrcp.f32 %v1168_v51  ;;  %v1988_v48 = vld [vmem:[%s2268_s16] sm:$0xff]  ;;  %v884_v51 = vpack.c.bf16 %v2386_v38, %v2386_v38 }
 0x539   : > { %v919_v50 = vpack.c.bf16 %v918_v47, %v918_v47  ;;  %1049 = vmatpush.bf16.msrb.mxu2 %v1040_v49  ;;  %v1032_v57 = vmul.f32 %v2077_v52, %v2402_v8  ;;  %v1989_v47 = vld [vmem:[%s2268_s16 + $0x8] sm:$0xff]  ;;  %v2043_v38 = vld [vmem:[%s2579_s17] ss:$0 sm:$0xff] }
 0x53a   : > { %1358 = vmatpush.bf16.msra.mxu0 %v1989_v47 }
 0x53b   : > { %1902 = vmatmul.msk.bf16.vlgmr.msra.gmra.mxu2 %vm830_vm9, %v919_v50  ;;  %v1033_v53 = vpack.c.bf16 %v1032_v57, %v1032_v57 }
 0x53d   : > { %1187 = vmatpush.bf16.msra.mxu2 %v1178_v31 }
 0x53e   : > { %v2079_v56 = vpop.eup %2078  ;;  %1359 = vmatpush.bf16.msra.mxu0 %v1988_v48 }
 0x53f   : > { %v1225_v54 = vpop.xlane.xlu0 %1224  ;;  %v1170_v60 = vmul.f32 %v2079_v56, %v2407_v19 }
 0x541   : > { %v1171_v61 = vpack.c.bf16 %v1170_v60, %v1170_v60 }
 0x547   : > { %v1282_v62 = vpop.xlane.xlu1 %1281 }
 0x548   : > { %2080 = vrcp.f32 %v1282_v62 }
 0x54b   : > { %1906 = vmatmul.msk.bf16.vlgmr.msrb.gmra.mxu2 %vm830_vm9, %v1033_v53 }
 0x54e   : > { %v2081_v0 = vpop.eup %2080 }
 0x54f   : > { %v1284_v3 = vmul.f32 %v2081_v0, %v2069_v27 }
 0x551   : > { %v1285_v5 = vpack.c.bf16 %v1284_v3, %v1284_v3 }
 0x552   : > { %v1287_v58 = vpop.permute.xlu0 %1286 }
 0x553   : > { %v1292_v59 = vsel %vm867_vm10, %v1287_v58, 0 }
 0x554   : > { %1301 = vmatpush.bf16.msrb.mxu2 %v1292_v59 }
 0x55b   : > { %v994_v63 = vpop.f32.mrf.mxu1  ;;  %1910 = vmatmul.msk.bf16.vlgmr.msra.gmra.mxu2 %vm830_vm9, %v1171_v61 }
 0x55c   : > { %v998_v27 = vpack.c.bf16 %v994_v63, %v994_v63 }
 0x563   : > { %v996_v1 = vpop.f32.mrf.mxu1 }
 0x56b   : > { %1914 = vmatmul.msk.bf16.vlgmr.msrb.gmra.mxu2 %vm830_vm9, %v1285_v5 }
 0x570   : > { %v1111_v6 = vpop.xlane.xlu2 %1110 }
 0x571   : > { %2082 = vrcp.f32 %v1111_v6 }
 0x572   : > { %2084 = vrcp.f32 %v1225_v54 }
 0x577   : > { %v2083_v7 = vpop.eup %2082 }
 0x578   : > { %v1113_v8 = vmul.f32 %v2083_v7, %v2073_v42  ;;  %v1230_v9 = vpop.permute.xlu2 %1229  ;;  %v2085_v13 = vpop.eup %2084 }
 0x579   : > { %v1235_v10 = vsel %vm867_vm10, %v1230_v9, 0  ;;  %v1227_v14 = vmul.f32 %v2085_v13, %v2411_v22  ;;  %v1062_v22 = vunpack.c.l.b16 %v998_v27 }
 0x57a   : > { %v1114_v11 = vpack.c.bf16 %v1113_v8, %v1113_v8  ;;  %1244 = vmatpush.bf16.msrb.mxu1 %v1235_v10 }
 0x57b   : > { %v1228_v15 = vpack.c.bf16 %v1227_v14, %v1227_v14  ;;  %v1063_v30 = vpack.c.b16 %v1062_v22, %v1062_v22 }
 0x57c   : > { %1908 = vmatmul.msk.bf16.vlgmr.msra.gmra.mxu1 %vm830_vm9, %v1114_v11 }
 0x58c   : > { %1912 = vmatmul.msk.bf16.vlgmr.msrb.gmra.mxu1 %vm830_vm9, %v1228_v15 }
 0x5be   : > { %v937_v16 = vpop.f32.mrf.mxu2 }
 0x5bf   : > { %v941_v17 = vpack.c.bf16 %v937_v16, %v937_v16 }
 0x5c1   : > { %v1057_v18 = vunpack.c.l.b16 %v941_v17 }
 0x5c3   : > { %v1058_v19 = vpack.c.b16 %v1057_v18, %v1057_v18 }
 0x5c5   : > { %1059 = vrot.lane.b32.xlu0 %v1058_v19, %s2135_s23 }
 0x5c6   : > { %v939_v20 = vpop.f32.mrf.mxu2 }
 0x5c7   : > { %v1991_v20 = vld [vmem:[%s2281_s20 + $0x8] sm:$0xff] }
 0x5c8   : > { %1460 = vmatpush.bf16.msra.mxu1 %v1991_v20 }
 0x5ce   : > { %v1051_v21 = vpop.f32.mrf.mxu2 }
 0x5cf   : > { %v1055_v35 = vpack.c.bf16 %v1051_v21, %v1051_v21 }
 0x5d1   : > { %v1067_v39 = vunpack.c.l.b16 %v1055_v35 }
 0x5d3   : > { %v1068_v40 = vpack.c.b16 %v1067_v39, %v1067_v39 }
 0x5d6   : > { %v1053_v23 = vpop.f32.mrf.mxu2 }
 0x5de   : > { %v1189_v24 = vpop.f32.mrf.mxu2 }
 0x5df   : > { %v1193_v25 = vpack.c.bf16 %v1189_v24, %v1189_v24 }
 0x5e1   : > { %v1309_v26 = vunpack.c.l.b16 %v1193_v25  ;;  %v1990_v25 = vld [vmem:[%s2281_s20] sm:$0xff] }
 0x5e2   : > { %1461 = vmatpush.bf16.msra.mxu1 %v1990_v25 }
 0x5e3   : > { %v1310_v28 = vpack.c.b16 %v1309_v26, %v1309_v26 }
 0x5e5   : > { %1311 = vrot.lane.b32.xlu0 %v1310_v28, %s2135_s23 }
 0x5e6   : > { %v1191_v29 = vpop.f32.mrf.mxu2 }
 0x5ed   : > { %1064 = vrot.lane.b32.xlu0 %v1063_v30, %s2136_s15 }
 0x5ee   : > { %v1303_v32 = vpop.f32.mrf.mxu2 }
 0x5ef   : > { %v1307_v33 = vpack.c.bf16 %v1303_v32, %v1303_v32 }
 0x5f1   : > { %v1319_v34 = vunpack.c.l.b16 %v1307_v33 }
 0x5f3   : > { %v1320_v36 = vpack.c.b16 %v1319_v34, %v1319_v34 }
 0x5f5   : > { %1321 = vrot.lane.b32.xlu2 %v1320_v36, %s2137_s28 }
 0x5f6   : > { %v1305_v37 = vpop.f32.mrf.mxu2 }
 0x5f9   : > { %v1132_v55 = vpop.f32.mrf.mxu1 }
 0x5fa   : > { %v1136_v52 = vpack.c.bf16 %v1132_v55, %v1132_v55 }
 0x5fd   : > { %1069 = vrot.lane.b32.xlu2 %v1068_v40, %s2137_s28 }
 0x601   : > { %v1134_v41 = vpop.f32.mrf.mxu1 }
 0x602   : > { %v2044_v41 = vld [vmem:[%s2580_s19] ss:$0 sm:$0xff] }
 0x609   : > { %v1246_v42 = vpop.f32.mrf.mxu1 }
 0x60a   : > { %v1250_v43 = vpack.c.bf16 %v1246_v42, %v1246_v42 }
 0x60c   : > { %v1314_v44 = vunpack.c.l.b16 %v1250_v43 }
 0x60e   : > { %v1315_v45 = vpack.c.b16 %v1314_v44, %v1314_v44 }
 0x610   : > { %1316 = vrot.lane.b32.xlu1 %v1315_v45, %s2136_s15  ;;  %v2045_v45 = vld [vmem:[%s692_s13] ss:$0 sm:$0xff]  ;;  %s2581_s15 = sld [smem:[#allocation9_spill]] (!%p1967_p6) }
 0x611   : > { %v1248_v46 = vpop.f32.mrf.mxu1 }
 0x637   : > { %v1060_v49 = vpop.permute.xlu0 %1059 }
 0x638   : > { %v1073_v53 = vsel %vm830_vm9, %v884_v51, %v1060_v49  ;;  %v1999_v51 = vld [vmem:[%s2295_s29 + $0x38] sm:$0xff] }
 0x639   : > { %1597 = vmatpush.bf16.msrb.mxu3 %v1999_v51 }
 0x64f   : > { %v1322_v31 = vpop.permute.xlu2 %1321 }
 0x657   : > { %v1312_v50 = vpop.permute.xlu0 %1311  ;;  %v1070_v61 = vpop.permute.xlu2 %1069 }
 0x658   : > { %v1325_v54 = vsel %vm830_vm9, %v1136_v52, %v1312_v50  ;;  %v1998_v52 = vld [vmem:[%s2295_s29 + $0x30] sm:$0xff] }
 0x659   : > { %1598 = vmatpush.bf16.msrb.mxu3 %v1998_v52 }
 0x65f   : > { %v1065_v57 = vpop.permute.xlu0 %1064 }
 0x660   : > { %v1076_v58 = vsel %vm1074_vm11, %v1073_v53, %v1065_v57  ;;  %v1997_v57 = vld [vmem:[%s2295_s29 + $0x28] sm:$0xff]  ;;  %v2046_v53 = vld [vmem:[%s700_s3] ss:$0 sm:$0xff] }
 0x661   : > { %v1079_v63 = vsel %vm1077_vm12, %v1076_v58, %v1070_v61  ;;  %1599 = vmatpush.bf16.msrb.mxu3 %v1997_v57 }
 0x682   : > { %v1317_v56 = vpop.permute.xlu1 %1316 }
 0x683   : > { %v1327_v59 = vsel %vm1074_vm11, %v1325_v54, %v1317_v56  ;;  %v1996_v54 = vld [vmem:[%s2295_s29 + $0x20] sm:$0xff] }
 0x684   : > { %v1329_v60 = vsel %vm1077_vm12, %v1327_v59, %v1322_v31  ;;  %1600 = vmatpush.bf16.msrb.mxu3 %v1996_v54 }
 0x685   : > { %v1331_v62 = vrot.slane %v1329_v60, 4  ;;  %v1995_v60 = vld [vmem:[%s2295_s29 + $0x18] sm:$0xff] }
 0x687   : > { %v1333_v0 = vsel %vm867_vm10, %v1079_v63, %v1331_v62  ;;  %v1994_v63 = vld [vmem:[%s2295_s29 + $0x10] sm:$0xff] }
 0x688   : > { %1923 = vmatmul.msk.bf16.vlgmr.msra.gmra.mxu0 %vm730_vm1, %v1333_v0  ;;  %1601 = vmatpush.bf16.msrb.mxu3 %v1995_v60 }
 0x68c   : > { %1602 = vmatpush.bf16.msrb.mxu3 %v1994_v63 }
 0x705   : > { %v1361_v1 = vpop.f32.mrf.mxu0 }
 0x706   : > { %v1366_v3 = vadd.f32 %v1361_v1, %v2304_v2 }
 0x708   : > { %v2453_v5 = vadd.f32 %v2043_v38, %v1366_v3 }
 0x70a   : > { %v1376_v6 = vsel %vm730_vm1, %v2453_v5, 0.0 }
 0x70b   : > { %1377 = vadd.xlane.f32.xlu0 %v1376_v6 }
 0x70d   : > { %v1363_v7 = vpop.f32.mrf.mxu0 }
 0x70e   : > { %v1367_v8 = vadd.f32 %v1363_v7, %v2308_v4 }
 0x710   : > { %v2458_v9 = vadd.f32 %v2043_v38, %v1367_v8  ;;  %v1993_v8 = vld [vmem:[%s2295_s29 + $0x8] sm:$0xff] }
 0x711   : > { %1603 = vmatpush.bf16.msrb.mxu3 %v1993_v8 }
 0x712   : > { %v1379_v10 = vsel %vm730_vm1, %v2458_v9, 0.0 }
 0x713   : > { %1380 = vadd.xlane.f32.xlu2 %v1379_v10 }
 0x77e   : > { %v1378_v11 = vpop.xlane.xlu0 %1377 }
 0x77f   : > { %v1382_v13 = vmul.f32 %v1378_v11, %v2312_v12 }
 0x781   : > { %v1384_v2 = vsub.f32 %v2453_v5, %v1382_v13 }
 0x783   : > { %v1386_v14 = vmul.f32 %v1384_v2, %v1384_v2 }
 0x785   : > { %v1388_v15 = vsel %vm730_vm1, %v1386_v14, 0.0 }
 0x786   : > { %1389 = vadd.xlane.f32.xlu1 %v1388_v15  ;;  %v1381_v16 = vpop.xlane.xlu2 %1380 }
 0x787   : > { %v1383_v4 = vmul.f32 %v1381_v16, %v2312_v12  ;;  %v1992_v16 = vld [vmem:[%s2295_s29] sm:$0xff] }
 0x788   : > { %1604 = vmatpush.bf16.msrb.mxu3 %v1992_v16 }
 0x789   : > { %v1385_v17 = vsub.f32 %v2458_v9, %v1383_v4 }
 0x78b   : > { %v1387_v18 = vmul.f32 %v1385_v17, %v1385_v17 }
 0x78d   : > { %v1391_v19 = vsel %vm730_vm1, %v1387_v18, 0.0 }
 0x78e   : > { %1392 = vadd.xlane.f32.xlu0 %v1391_v19 }
 0x7f9   : > { %v1390_v21 = vpop.xlane.xlu1 %1389 }
 0x7fa   : > { %v1394_v23 = vmul.f32 %v1390_v21, %v2312_v12 }
 0x7fc   : > { %v1396_v24 = vadd.f32 1e-05, %v1394_v23 }
 0x7fe   : > { %2086 = vrsqrt.f32 %v1396_v24  ;;  %vm1404_vm14 = vweird.f32 %v1396_v24 }
 0x801   : > { %v1393_v26 = vpop.xlane.xlu0 %1392 }
 0x802   : > { %v1395_v27 = vmul.f32 %v1393_v26, %v2312_v12 }
 0x804   : > { %v2087_v28 = vpop.eup %2086  ;;  %v1397_v29 = vadd.f32 1e-05, %v1395_v27 }
 0x805   : > { %v1399_v22 = vmul.f32 %v2087_v28, %v1396_v24  ;;  %vm1405_vm13 = vweird.f32 %v2087_v28 }
 0x806   : > { %2088 = vrsqrt.f32 %v1397_v29  ;;  %vm1406_vm15 = vmor %vm1404_vm14, %vm1405_vm13  ;;  %vm1414_vm2 = vweird.f32 %v1397_v29 }
 0x807   : > { %v1400_v30 = vmul.f32 %v2087_v28, %v1399_v22 }
 0x809   : > { %v1401_v32 = vmul.f32 0.5, %v1400_v30 }
 0x80b   : > { %v1402_v33 = vsub.f32 1.5, %v1401_v32 }
 0x80c   : > { %v2089_v34 = vpop.eup %2088 }
 0x80d   : > { %v1403_v35 = vmul.f32 %v2087_v28, %v1402_v33  ;;  %v1409_v36 = vmul.f32 %v2089_v34, %v1397_v29  ;;  %vm1415_vm0 = vweird.f32 %v2089_v34 }
 0x80e   : > { %vm1416_vm3 = vmor %vm1414_vm2, %vm1415_vm0 }
 0x80f   : > { %v1410_v37 = vmul.f32 %v2089_v34, %v1409_v36  ;;  %v1407_v39 = vsel %vm1406_vm15, %v2087_v28, %v1403_v35 }
 0x810   : > { %v1418_v42 = vmul.f32 %v1407_v39, %v1384_v2 }
 0x811   : > { %v1411_v55 = vmul.f32 0.5, %v1410_v37 }
 0x812   : > { %v1423_v46 = vmul.f32 %v2044_v41, %v1418_v42 }
 0x813   : > { %v1412_v40 = vsub.f32 1.5, %v1411_v55 }
 0x814   : > { %v1428_v49 = vadd.f32 %v2045_v45, %v1423_v46 }
 0x815   : > { %v1413_v43 = vmul.f32 %v2089_v34, %v1412_v40 }
 0x817   : > { %v1417_v44 = vsel %vm1416_vm3, %v2089_v34, %v1413_v43 }
 0x818   : > { %v1419_v47 = vmul.f32 %v1417_v44, %v1385_v17 }
 0x81a   : > { %v1424_v48 = vmul.f32 %v2044_v41, %v1419_v47 }
 0x81c   : > { %v1429_v50 = vadd.f32 %v2045_v45, %v1424_v48 }
 0x81e   : > { %v1430_v31 = vpack.c.bf16 %v1429_v50, %v1428_v49 }
 0x820   : > { %1932 = vmatmul.msk.bf16.vlgmr.msra.gmra.mxu1 %vm730_vm1, %v1430_v31 }
 0x89d   : > { %v1463_v56 = vpop.f32.mrf.mxu1 }
 0x89e   : > { %v2492_v58 = vadd.f32 %v2046_v53, %v1463_v56 }
 0x8a0   : > { %v1470_v59 = vmul.f32 0.70710677, %v2492_v58  ;;  %v1468_v56 = vmul.f32 0.5, %v2492_v58 }
 0x8a2   : > { %v1933_v61 = vclamps-f32 %v1470_v59, 3.832507 }
 0x8a4   : > { %v1476_v62 = vmul.f32 %v1933_v61, %v1933_v61 }
 0x8a5   : > { %v1465_v0 = vpop.f32.mrf.mxu1 }
 0x8a6   : > { %v1478_v38 = vmul.f32 -2.7261424e-10, %v1476_v62  ;;  %v1504_v1 = vmul.f32 -1.45660715e-05, %v1476_v62  ;;  %v1466_v3 = vadd.f32 %v2046_v53, %v1465_v0 }
 0x8a8   : > { %v1480_v6 = vadd.f32 2.7706815e-08, %v1478_v38  ;;  %v1506_v7 = vadd.f32 -0.00021337405, %v1504_v1  ;;  %v1471_v10 = vmul.f32 0.70710677, %v1466_v3 }
 0x8a9   : > { %v1469_v59 = vmul.f32 0.5, %v1466_v3 }
 0x8aa   : > { %v1482_v11 = vmul.f32 %v1480_v6, %v1476_v62  ;;  %v1508_v13 = vmul.f32 %v1506_v7, %v1476_v62  ;;  %v1934_v2 = vclamps-f32 %v1471_v10, 3.832507 }
 0x8ac   : > { %v1484_v14 = vadd.f32 -2.101024e-06, %v1482_v11  ;;  %v1510_v15 = vadd.f32 -0.001682827, %v1508_v13  ;;  %v1477_v4 = vmul.f32 %v1934_v2, %v1934_v2 }
 0x8ae   : > { %v1486_v17 = vmul.f32 %v1484_v14, %v1476_v62  ;;  %v1512_v18 = vmul.f32 %v1510_v15, %v1476_v62  ;;  %v1479_v19 = vmul.f32 -2.7261424e-10, %v1477_v4  ;;  %v1505_v20 = vmul.f32 -1.45660715e-05, %v1477_v4 }
 0x8b0   : > { %v1488_v21 = vadd.f32 -5.6925062e-05, %v1486_v17  ;;  %v1481_v23 = vadd.f32 2.7706815e-08, %v1479_v19  ;;  %v1507_v24 = vadd.f32 -0.00021337405, %v1505_v20 }
 0x8b1   : > { %v1514_v26 = vadd.f32 -0.0073733293, %v1512_v18 }
 0x8b2   : > { %v1490_v25 = vmul.f32 %v1488_v21, %v1476_v62  ;;  %v1483_v27 = vmul.f32 %v1481_v23, %v1477_v4  ;;  %v1509_v28 = vmul.f32 %v1507_v24, %v1477_v4 }
 0x8b3   : > { %v1516_v33 = vmul.f32 %v1514_v26, %v1476_v62 }
 0x8b4   : > { %v1492_v29 = vadd.f32 -0.00073499064, %v1490_v25  ;;  %v1485_v22 = vadd.f32 -2.101024e-06, %v1483_v27  ;;  %v1511_v30 = vadd.f32 -0.001682827, %v1509_v28 }
 0x8b5   : > { %v1518_v40 = vadd.f32 -0.014264739, %v1516_v33 }
 0x8b6   : > { %v1494_v32 = vmul.f32 %v1492_v29, %v1476_v62  ;;  %v1487_v34 = vmul.f32 %v1485_v22, %v1477_v4  ;;  %v1513_v35 = vmul.f32 %v1511_v30, %v1477_v4 }
 0x8b7   : > { %2090 = vrcp.f32 %v1518_v40 }
 0x8b8   : > { %v1496_v36 = vadd.f32 -0.0029546, %v1494_v32  ;;  %v1489_v37 = vadd.f32 -5.6925062e-05, %v1487_v34  ;;  %v1515_v39 = vadd.f32 -0.0073733293, %v1513_v35 }
 0x8ba   : > { %v1498_v55 = vmul.f32 %v1496_v36, %v1476_v62  ;;  %v1491_v41 = vmul.f32 %v1489_v37, %v1477_v4  ;;  %v1517_v42 = vmul.f32 %v1515_v39, %v1477_v4 }
 0x8bc   : > { %v1500_v43 = vadd.f32 -0.016096033, %v1498_v55  ;;  %v1493_v44 = vadd.f32 -0.00073499064, %v1491_v41  ;;  %v1519_v45 = vadd.f32 -0.014264739, %v1517_v42 }
 0x8bd   : > { %v2091_v50 = vpop.eup %2090 }
 0x8be   : > { %v1495_v46 = vmul.f32 %v1493_v44, %v1477_v4  ;;  %v1502_v47 = vmul.f32 %v1933_v61, %v1500_v43  ;;  %2092 = vrcp.f32 %v1519_v45  ;;  %v2047_v61 = vld [vmem:[%s708_s12] ss:$0 sm:$0xff] }
 0x8c0   : > { %v1497_v48 = vadd.f32 -0.0029546, %v1495_v46  ;;  %v1522_v31 = vmul.f32 %v2091_v50, %v1502_v47 }
 0x8c2   : > { %v1499_v49 = vmul.f32 %v1497_v48, %v1477_v4  ;;  %v1524_v53 = vadd.f32 1.0, %v1522_v31 }
 0x8c4   : > { %v1501_v51 = vadd.f32 -0.016096033, %v1499_v49  ;;  %v2093_v57 = vpop.eup %2092  ;;  %v1526_v62 = vmul.f32 %v1524_v53, %v1468_v56 }
 0x8c6   : > { %v1503_v52 = vmul.f32 %v1934_v2, %v1501_v51 }
 0x8c8   : > { %v1523_v54 = vmul.f32 %v2093_v57, %v1503_v52 }
 0x8ca   : > { %v1525_v60 = vadd.f32 1.0, %v1523_v54 }
 0x8cc   : > { %v1527_v63 = vmul.f32 %v1525_v60, %v1469_v59 }
 0x8ce   : > { %v1528_v0 = vpack.c.bf16 %v1527_v63, %v1526_v62 }
 0x8d0   : > { %1605 = vmatmul.bf16.vlgmr.msrb.gmra.mxu3 %v1528_v0 }
 0x953   : > { %v1606_v38 = vpop.f32.mrf.mxu3 }
 0x954   : > { %v1607_v1 = vadd.f32 %v2047_v61, %v1606_v38 }
 0x956   : > { %v1611_v6 = vadd.f32 %v1607_v1, %v2453_v5 }
 0x958   : > { %1613 = vst.msk [vmem:[#allocation2] sm:$0xff] %vm730_vm1, %v1611_v6 }
 0x95b   : > { %v1608_v7 = vpop.f32.mrf.mxu3 }
 0x95c   : > { %v1609_v8 = vadd.f32 %v2047_v61, %v1608_v7  ;;  %1618 = sbr.rel (%p1967_p6) target bundleno = 2808 (0xaf8), region = 92 }
 0x95e   : > { %v1612_v58 = vadd.f32 %v1609_v8, %v2458_v9 }
 0x960   : > { %1614 = vst.msk [vmem:[#allocation2 + $0x8] sm:$0xff] %vm730_vm1, %v1612_v58 }
 0x961   : > { %v1620_v3 = vrot.slane %v1611_v6, 5  ;;  %v1623_v10 = vrot.slane %v1612_v58, 2  ;;  %vm1625_vm4 = vcmask 1042432   ;;  %vm1629_vm5 = vcmask 259072   ;;  %v2001_v9 = vld [vmem:[%s2557_s14 + $0x8] sm:$0xff]  ;;  %v2000_v4 = vld [vmem:[%s2557_s14] sm:$0xff] }
 0x962   : > { %1690 = vmatpush.bf16.msra.mxu0 %v2001_v9  ;;  %v2094_v27 = vld [vmem:[%s2581_s15] ss:$0 sm:$0xff] }
 0x963   : > { %v1626_v11 = vsel %vm1625_vm4, %v1620_v3, %v1623_v10  ;;  %v2096_v33 = vld [vmem:[%s2583_s18] ss:$0 sm:$0xff] }
 0x964   : > { %v1630_v13 = vsel %vm1629_vm5, %v1626_v11, 0.0 }
 0x965   : > { %1631 = vadd.xlane.f32.xlu0 %v1630_v13 }
 0x966   : > { %1691 = vmatpush.bf16.msra.mxu0 %v2000_v4 }
 0x9d8   : > { %v1632_v2 = vpop.xlane.xlu0 %1631 }
 0x9d9   : > { %v1633_v5 = vmul.f32 %v1632_v2, %v2312_v12 }
 0x9db   : > { %v1634_v14 = vsub.f32 %v1626_v11, %v1633_v5 }
 0x9dd   : > { %v1635_v15 = vmul.f32 %v1634_v14, %v1634_v14 }
 0x9df   : > { %v1636_v16 = vsel %vm1629_vm5, %v1635_v15, 0.0 }
 0x9e0   : > { %1637 = vadd.xlane.f32.xlu0 %v1636_v16 }
 0xa53   : > { %v1638_v17 = vpop.xlane.xlu0 %1637 }
 0xa54   : > { %v1639_v18 = vmul.f32 %v1638_v17, %v2312_v12  ;;  %v2095_v12 = vld [vmem:[%s2582_s0] ss:$0 sm:$0xff] }
 0xa56   : > { %v1640_v19 = vadd.f32 1e-05, %v1639_v18 }
 0xa58   : > { %2097 = vrsqrt.f32 %v1640_v19  ;;  %vm1647_vm7 = vweird.f32 %v1640_v19 }
 0xa5e   : > { %v2098_v20 = vpop.eup %2097 }
 0xa5f   : > { %v1642_v21 = vmul.f32 %v2098_v20, %v1640_v19  ;;  %vm1648_vm6 = vweird.f32 %v2098_v20 }
 0xa60   : > { %vm1649_vm8 = vmor %vm1647_vm7, %vm1648_vm6 }
 0xa61   : > { %v1643_v23 = vmul.f32 %v2098_v20, %v1642_v21 }
 0xa63   : > { %v1644_v24 = vmul.f32 0.5, %v1643_v23 }
 0xa65   : > { %v1645_v25 = vsub.f32 1.5, %v1644_v24 }
 0xa67   : > { %v1646_v26 = vmul.f32 %v2098_v20, %v1645_v25 }
 0xa69   : > { %v1650_v28 = vsel %vm1649_vm8, %v2098_v20, %v1646_v26 }
 0xa6a   : > { %v1651_v29 = vmul.f32 %v1650_v28, %v1634_v14 }
 0xa6c   : > { %v1655_v22 = vmul.f32 %v2094_v27, %v1651_v29 }
 0xa6e   : > { %v1659_v30 = vadd.f32 %v2095_v12, %v1655_v22 }
 0xa70   : > { %v1660_v32 = vpack.c.bf16 %v1659_v30, %v1659_v30 }
 0xa72   : > { %1976 = vmatmul.msk.bf16.vlgmr.msra.gmra.mxu0 %vm730_vm1, %v1660_v32 }
 0xaef   : > { %v1693_v34 = vpop.f32.mrf.mxu0 }
 0xaf0   : > { %v1694_v35 = vadd.f32 %v2096_v33, %v1693_v34 }
 0xaf2   : > { %1697 = vst [vmem:[%s2584_s27] sm:$0x7] %v1694_v35 }
 0xaf3   : > { %1977 = vst [vmem:[%s2584_s27 + $0x1] sm:$0x38] %v1694_v35 }
 0xaf7   : > { %v1695_v36 = vpop.f32.mrf.mxu0 }
 0xaf8 PF: > { %s2585_s3 = sld [smem:[#allocation4_spill]] }
 0xaf9   : > { %s2586_s21 = sld [smem:[#allocation3_spill]] }
 0xafa   : > { %s2587_s22 = sld [smem:[#allocation5_spill]] }
 0xafe   : > { %s26_s23 = sadd.s32 1, %s2585_s3  }
 0xaff   : > { %p23_p7 = scmp.ge.s32.totalorder %s26_s23, 4  }
 0xb01   :  { %25 = sbr.rel (!%p23_p7) target bundleno = 8 (0x8), region = 157 }

</bundles_post_ra>
